<compile_context>
chip_gen: v7x
topology: tpu7x:2x2x1
jax: 0.10.0
libtpu: 0.0.40
codegen_flags: <defaults>
</compile_context>

<pallas_src>
import jax
import jax.numpy as jnp
from jax.experimental import pallas as pl
from jax.experimental.pallas import tpu as pltpu

FEATURE_DIM = 2048                      # hardwired in model_bn (2048 * 1 * 1)
HID_DIM = 48                            # constructor arg (default 512; small here)
LABEL_HIERARCHY = (4, 21, 23)           # [order, family, species]
N_CLS_TOTAL = sum(LABEL_HIERARCHY)      # 48 fused classifier lanes
OUT_LANES = 128                         # lane-dense packed output width
LOSS_LANE = N_CLS_TOTAL                 # lane 48 carries the scalar loss
BN_EPS = 1e-5


def _mhn_head_kernel(pooled_ref, g1_ref, be1_ref, w1_ref, bl1_ref,
                     g2_ref, be2_ref, wc_ref, bc_ref, tgt_ref, out_ref):
    pooled = pooled_ref[...]                               # (B, 2048) f32
    bsz = pooled.shape[0]

    # nn.BatchNorm1d(feature_dim): training-mode batch stats, one reduction pass.
    mu1 = jnp.mean(pooled, axis=0, keepdims=True)
    ex2 = jnp.mean(pooled * pooled, axis=0, keepdims=True)
    var1 = jnp.maximum(ex2 - mu1 * mu1, 0.0)
    xn = (pooled - mu1) * jax.lax.rsqrt(var1 + BN_EPS)
    xn = xn * g1_ref[...] + be1_ref[...]

    # nn.Linear(feature_dim, hid_dim): bf16 weights/activations, f32 MXU accumulate.
    h = jnp.dot(xn.astype(jnp.bfloat16), w1_ref[...],
                preferred_element_type=jnp.float32) + bl1_ref[...]

    # nn.BatchNorm1d(hid_dim): one-pass stats.
    mu2 = jnp.mean(h, axis=0, keepdims=True)
    hx2 = jnp.mean(h * h, axis=0, keepdims=True)
    var2 = jnp.maximum(hx2 - mu2 * mu2, 0.0)
    hn = (h - mu2) * jax.lax.rsqrt(var2 + BN_EPS)
    hn = hn * g2_ref[...] + be2_ref[...]

    # nn.ELU(inplace=True), alpha=1 (exp on clamped input -> no inf in dead lanes).
    hn = jnp.where(hn > 0, hn, jnp.exp(jnp.minimum(hn, 0.0)) - 1.0)

    # All three classifier Linears fused into one (B, hid) @ (hid, 48) matmul.
    logits = jnp.dot(hn, wc_ref[...],
                     preferred_element_type=jnp.float32) + bc_ref[...]

    # --- Segmented softmax over the 48 fused lanes (single exp pass) ---------
    n0, n1, _ = LABEL_HIERARCHY
    lane = jax.lax.broadcasted_iota(jnp.int32, (1, N_CLS_TOTAL), 1)
    seg0 = lane < n0
    seg1 = jnp.logical_and(lane >= n0, lane < n0 + n1)

    def seg_bcast(r0, r1, r2):
        return jnp.where(seg0, r0, jnp.where(seg1, r1, r2))

    def seg_max(x, m):
        return jnp.max(jnp.where(m, x, -jnp.inf), axis=-1, keepdims=True)

    def seg_sum(x, m):
        return jnp.sum(jnp.where(m, x, 0.0), axis=-1, keepdims=True)

    m_b = seg_bcast(seg_max(logits, seg0), seg_max(logits, seg1),
                    seg_max(logits, ~(seg0 | seg1)))
    e = jnp.exp(logits - m_b)
    s_b = seg_bcast(seg_sum(e, seg0), seg_sum(e, seg1),
                    seg_sum(e, ~(seg0 | seg1)))
    probs = e * pl.reciprocal(s_b, approx=True)            # (B, 48) F.softmax per head

    # --- CrossEntropy(ignore_index=-1) on the softmax *probs* (as the reference:
    #     log_softmax(probs) then NLL, mean over non-ignored rows per head) -----
    pm_b = seg_bcast(seg_max(probs, seg0), seg_max(probs, seg1),
                     seg_max(probs, ~(seg0 | seg1)))
    pe = jnp.exp(probs - pm_b)
    lse_b = pm_b + jnp.log(seg_bcast(seg_sum(pe, seg0), seg_sum(pe, seg1),
                                     seg_sum(pe, ~(seg0 | seg1))))
    logp = probs - lse_b                                    # (B, 48)

    tgt = tgt_ref[...]                                      # (B, 3) int32
    t0, t1, t2 = tgt[:, 0:1], tgt[:, 1:2], tgt[:, 2:3]
    a0 = jnp.where(t0 >= 0, t0, -1)                         # fused-lane target idx
    a1 = jnp.where(t1 >= 0, t1 + n0, -1)
    a2 = jnp.where(t2 >= 0, t2 + (n0 + n1), -1)
    lane_b = jax.lax.broadcasted_iota(jnp.int32, (bsz, N_CLS_TOTAL), 1)
    hit = (lane_b == a0) | (lane_b == a1) | (lane_b == a2)
    picked = jnp.where(hit, logp, 0.0)                      # (B, 48)

    def head_loss(mask, tcol):
        num = jnp.sum(jnp.where(mask, picked, 0.0), keepdims=True)     # (1, 1)
        cnt = jnp.sum((tcol >= 0).astype(jnp.float32), keepdims=True)  # (1, 1)
        # den clamped >= 1: all-ignored head yields 0 (PyTorch would give NaN).
        return -num / jnp.maximum(cnt, 1.0)

    loss = head_loss(seg0, t0) + head_loss(seg1, t1) + head_loss(~(seg0 | seg1), t2)

    # --- One lane-dense (B, 128) store: probs | loss | zero pad --------------
    loss_col = jnp.broadcast_to(loss, (bsz, 1))
    pad = jnp.zeros((bsz, OUT_LANES - N_CLS_TOTAL - 1), jnp.float32)
    out_ref[...] = jnp.concatenate([probs, loss_col, pad], axis=-1)


def _vmem():
    return pl.BlockSpec(memory_space=pltpu.MemorySpace.VMEM)


def mhn_head_forward(feat_nchw, tgt_mat, params):
    """feat_nchw: (B, 2048, H, W);  tgt_mat: (B, 3) int32 [order, family, species]."""
    B, C, _, _ = feat_nchw.shape
    assert C == FEATURE_DIM
    # nn.AdaptiveAvgPool2d((1,1)) + flatten: contiguous-HW reduce in the producer's
    # native dtype/layout; only the tiny (B, 2048) f32 result is materialized.
    pooled = jnp.mean(feat_nchw, axis=(2, 3), dtype=jnp.float32)

    args = (pooled,
            params["bn1_g"], params["bn1_b"],
            params["fc_w"], params["fc_b"],
            params["bn2_g"], params["bn2_b"],
            params["cls_w"], params["cls_b"],
            tgt_mat)

    out = pl.pallas_call(
        _mhn_head_kernel,
        out_shape=jax.ShapeDtypeStruct((B, OUT_LANES), jnp.float32),
        in_specs=[_vmem() for _ in args],
        out_specs=_vmem(),
        compiler_params=pltpu.CompilerParams(
            # Let XLA fuse the HW-reduce producer of `pooled` (input 0) into the
            # call, eliminating the (B, 2048) HBM round trip + one dispatch.
            allow_input_fusion=[True] + [False] * (len(args) - 1)),
    )(*args)

    n0, n1, _ = LABEL_HIERARCHY
    ce_loss = out[0, LOSS_LANE]
    order_out = out[:, :n0]
    family_out = out[:, n0:n0 + n1]
    species_out = out[:, n0 + n1:N_CLS_TOTAL]
    return ce_loss, order_out, family_out, species_out


def get_order_family_target(species_targets):
    """Deterministic stand-in for the repo's trees-based lookup."""
    n_species = LABEL_HIERARCHY[2]
    order_table = jnp.arange(n_species, dtype=jnp.int32) % LABEL_HIERARCHY[0]
    family_table = jnp.arange(n_species, dtype=jnp.int32) % LABEL_HIERARCHY[1]
    order_t = order_table[species_targets]
    family_t = family_table[species_targets]
    return order_t, family_t, species_targets.astype(jnp.int32)


def model_bn_forward(x, targets, params):
    """Mirrors model_bn.forward(x, targets) (minus the external conv backbone)."""
    order_t, family_t, species_t = get_order_family_target(targets)
    tgt_mat = jnp.stack([order_t, family_t, species_t], axis=1).astype(jnp.int32)
    ce_loss, order_out, family_out, species_out = mhn_head_forward(x, tgt_mat, params)
    return (ce_loss,
            [species_out, species_t],
            [family_out, family_t],
            [order_out, order_t])


def init_params(key, hid_dim=HID_DIM):
    ks = jax.random.split(key, 10)

    def lin(kw, kb, fan_in, fan_out):
        w = jax.random.normal(kw, (fan_in, fan_out), jnp.float32) / jnp.sqrt(fan_in)
        b = 0.01 * jax.random.normal(kb, (1, fan_out), jnp.float32)
        return w, b

    fc_w, fc_b = lin(ks[0], ks[1], FEATURE_DIM, hid_dim)
    c0w, c0b = lin(ks[2], ks[3], hid_dim, LABEL_HIERARCHY[0])
    c1w, c1b = lin(ks[4], ks[5], hid_dim, LABEL_HIERARCHY[1])
    c2w, c2b = lin(ks[6], ks[7], hid_dim, LABEL_HIERARCHY[2])
    return {
        "bn1_g": jnp.ones((1, FEATURE_DIM), jnp.float32)
                 + 0.05 * jax.random.normal(ks[8], (1, FEATURE_DIM), jnp.float32),
        "bn1_b": 0.05 * jax.random.normal(ks[9], (1, FEATURE_DIM), jnp.float32),
        # Dominant weight bytes live in bf16 in HBM; MXU accumulates in f32.
        "fc_w": fc_w.astype(jnp.bfloat16),
        "fc_b": fc_b,
        "bn2_g": jnp.ones((1, hid_dim), jnp.float32),
        "bn2_b": jnp.zeros((1, hid_dim), jnp.float32),
        # Three classifier heads fused into one (hid, 4+21+23) weight / bias.
        "cls_w": jnp.concatenate([c0w, c1w, c2w], axis=1),
        "cls_b": jnp.concatenate([c0b, c1b, c2b], axis=1),
    }


if __name__ == "__main__":
    key = jax.random.PRNGKey(0)
    k_x, k_t, k_p = jax.random.split(key, 3)

    B, H, W = 8, 4, 4
    # Backbone (ResNet-style, children[:-2]) output feature map: (B, 2048, H, W).
    x = jax.random.normal(k_x, (B, FEATURE_DIM, H, W), jnp.float32)
    # Species-level targets in [0, 23).
    targets = jax.random.randint(k_t, (B,), 0, LABEL_HIERARCHY[2], jnp.int32)
    params = init_params(k_p)

    out = model_bn_forward(x, targets, params)
    out = jax.block_until_ready(out)

    ce_loss = out[0]
    species_out, species_t = out[1]
    family_out, family_t = out[2]
    order_out, order_t = out[3]
    assert ce_loss.shape == ()
    assert species_out.shape == (B, LABEL_HIERARCHY[2])
    assert family_out.shape == (B, LABEL_HIERARCHY[1])
    assert order_out.shape == (B, LABEL_HIERARCHY[0])
    assert bool(jnp.isfinite(ce_loss))
    # Each head's probabilities should sum to ~1 per row (approx reciprocal in use).
    assert bool(jnp.all(jnp.abs(jnp.sum(species_out, axis=-1) - 1.0) < 1e-2))
    print("KERNEL_OK")
</pallas_src>

<mosaic_0001>
module attributes {stable_mosaic.version = 11 : i64} {
  func.func @_mhn_head_kernel(%arg0: memref<8x2048xf32, #tpu.memory_space<vmem>>, %arg1: memref<1x2048xf32, #tpu.memory_space<vmem>>, %arg2: memref<1x2048xf32, #tpu.memory_space<vmem>>, %arg3: memref<2048x48xbf16, #tpu.memory_space<vmem>>, %arg4: memref<1x48xf32, #tpu.memory_space<vmem>>, %arg5: memref<1x48xf32, #tpu.memory_space<vmem>>, %arg6: memref<1x48xf32, #tpu.memory_space<vmem>>, %arg7: memref<48x48xf32, #tpu.memory_space<vmem>>, %arg8: memref<1x48xf32, #tpu.memory_space<vmem>>, %arg9: memref<8x3xi32, #tpu.memory_space<vmem>>, %arg10: memref<8x128xf32, #tpu.memory_space<vmem>>) attributes {dimension_semantics = [], scalar_prefetch = 0 : i64, scratch_operands = 0 : i64, tpu.core_type = #tpu.core_type<tc>} {
    %c0 = arith.constant 0 : index
    %c0_0 = arith.constant 0 : index
    %0 = vector.load %arg0[%c0, %c0_0] : memref<8x2048xf32, #tpu.memory_space<vmem>>, vector<8x2048xf32>
    %cst = arith.constant dense<0.000000e+00> : vector<2048xf32>
    %1 = vector.multi_reduction <add>, %0, %cst [0] : vector<8x2048xf32> to vector<2048xf32>
    %2 = vector.shape_cast %1 : vector<2048xf32> to vector<1x2048xf32>
    %cst_1 = arith.constant 8.000000e+00 : f32
    %3 = vector.broadcast %cst_1 : f32 to vector<1x2048xf32>
    %4 = arith.divf %2, %3 : vector<1x2048xf32>
    %5 = arith.mulf %0, %0 : vector<8x2048xf32>
    %cst_2 = arith.constant dense<0.000000e+00> : vector<2048xf32>
    %6 = vector.multi_reduction <add>, %5, %cst_2 [0] : vector<8x2048xf32> to vector<2048xf32>
    %7 = vector.shape_cast %6 : vector<2048xf32> to vector<1x2048xf32>
    %cst_3 = arith.constant 8.000000e+00 : f32
    %8 = vector.broadcast %cst_3 : f32 to vector<1x2048xf32>
    %9 = arith.divf %7, %8 : vector<1x2048xf32>
    %10 = arith.mulf %4, %4 : vector<1x2048xf32>
    %11 = arith.subf %9, %10 : vector<1x2048xf32>
    %cst_4 = arith.constant 0.000000e+00 : f32
    %12 = vector.broadcast %cst_4 : f32 to vector<1x2048xf32>
    %13 = arith.maximumf %11, %12 : vector<1x2048xf32>
    %14 = vector.broadcast %4 : vector<1x2048xf32> to vector<8x2048xf32>
    %15 = arith.subf %0, %14 : vector<8x2048xf32>
    %cst_5 = arith.constant 9.99999974E-6 : f32
    %16 = vector.broadcast %cst_5 : f32 to vector<1x2048xf32>
    %17 = arith.addf %13, %16 : vector<1x2048xf32>
    %18 = math.rsqrt %17 : vector<1x2048xf32>
    %19 = vector.broadcast %18 : vector<1x2048xf32> to vector<8x2048xf32>
    %20 = arith.mulf %15, %19 : vector<8x2048xf32>
    %c0_6 = arith.constant 0 : index
    %c0_7 = arith.constant 0 : index
    %21 = vector.load %arg1[%c0_6, %c0_7] : memref<1x2048xf32, #tpu.memory_space<vmem>>, vector<1x2048xf32>
    %22 = vector.broadcast %21 : vector<1x2048xf32> to vector<8x2048xf32>
    %23 = arith.mulf %20, %22 : vector<8x2048xf32>
    %c0_8 = arith.constant 0 : index
    %c0_9 = arith.constant 0 : index
    %24 = vector.load %arg2[%c0_8, %c0_9] : memref<1x2048xf32, #tpu.memory_space<vmem>>, vector<1x2048xf32>
    %25 = vector.broadcast %24 : vector<1x2048xf32> to vector<8x2048xf32>
    %26 = arith.addf %23, %25 : vector<8x2048xf32>
    %27 = arith.truncf %26 : vector<8x2048xf32> to vector<8x2048xbf16>
    %c0_10 = arith.constant 0 : index
    %c0_11 = arith.constant 0 : index
    %28 = vector.load %arg3[%c0_10, %c0_11] : memref<2048x48xbf16, #tpu.memory_space<vmem>>, vector<2048x48xbf16>
    %cst_12 = arith.constant dense<0.000000e+00> : vector<8x48xf32>
    %29 = tpu.matmul %27, %28, %cst_12 {dimension_numbers = #tpu.dot_dimension_numbers<[1], [0], [0], [1], [0, 0, 1, 1], [], []>} : vector<8x2048xbf16>, vector<2048x48xbf16>, vector<8x48xf32> -> vector<8x48xf32>
    %c0_13 = arith.constant 0 : index
    %c0_14 = arith.constant 0 : index
    %30 = vector.load %arg4[%c0_13, %c0_14] : memref<1x48xf32, #tpu.memory_space<vmem>>, vector<1x48xf32>
    %31 = vector.broadcast %30 : vector<1x48xf32> to vector<8x48xf32>
    %32 = arith.addf %29, %31 : vector<8x48xf32>
    %cst_15 = arith.constant dense<0.000000e+00> : vector<48xf32>
    %33 = vector.multi_reduction <add>, %32, %cst_15 [0] : vector<8x48xf32> to vector<48xf32>
    %34 = vector.shape_cast %33 : vector<48xf32> to vector<1x48xf32>
    %cst_16 = arith.constant 8.000000e+00 : f32
    %35 = vector.broadcast %cst_16 : f32 to vector<1x48xf32>
    %36 = arith.divf %34, %35 : vector<1x48xf32>
    %37 = arith.mulf %32, %32 : vector<8x48xf32>
    %cst_17 = arith.constant dense<0.000000e+00> : vector<48xf32>
    %38 = vector.multi_reduction <add>, %37, %cst_17 [0] : vector<8x48xf32> to vector<48xf32>
    %39 = vector.shape_cast %38 : vector<48xf32> to vector<1x48xf32>
    %cst_18 = arith.constant 8.000000e+00 : f32
    %40 = vector.broadcast %cst_18 : f32 to vector<1x48xf32>
    %41 = arith.divf %39, %40 : vector<1x48xf32>
    %42 = arith.mulf %36, %36 : vector<1x48xf32>
    %43 = arith.subf %41, %42 : vector<1x48xf32>
    %cst_19 = arith.constant 0.000000e+00 : f32
    %44 = vector.broadcast %cst_19 : f32 to vector<1x48xf32>
    %45 = arith.maximumf %43, %44 : vector<1x48xf32>
    %46 = vector.broadcast %36 : vector<1x48xf32> to vector<8x48xf32>
    %47 = arith.subf %32, %46 : vector<8x48xf32>
    %cst_20 = arith.constant 9.99999974E-6 : f32
    %48 = vector.broadcast %cst_20 : f32 to vector<1x48xf32>
    %49 = arith.addf %45, %48 : vector<1x48xf32>
    %50 = math.rsqrt %49 : vector<1x48xf32>
    %51 = vector.broadcast %50 : vector<1x48xf32> to vector<8x48xf32>
    %52 = arith.mulf %47, %51 : vector<8x48xf32>
    %c0_21 = arith.constant 0 : index
    %c0_22 = arith.constant 0 : index
    %53 = vector.load %arg5[%c0_21, %c0_22] : memref<1x48xf32, #tpu.memory_space<vmem>>, vector<1x48xf32>
    %54 = vector.broadcast %53 : vector<1x48xf32> to vector<8x48xf32>
    %55 = arith.mulf %52, %54 : vector<8x48xf32>
    %c0_23 = arith.constant 0 : index
    %c0_24 = arith.constant 0 : index
    %56 = vector.load %arg6[%c0_23, %c0_24] : memref<1x48xf32, #tpu.memory_space<vmem>>, vector<1x48xf32>
    %57 = vector.broadcast %56 : vector<1x48xf32> to vector<8x48xf32>
    %58 = arith.addf %55, %57 : vector<8x48xf32>
    %cst_25 = arith.constant 0.000000e+00 : f32
    %59 = vector.broadcast %cst_25 : f32 to vector<8x48xf32>
    %60 = arith.cmpf ogt, %58, %59 : vector<8x48xf32>
    %cst_26 = arith.constant 0.000000e+00 : f32
    %61 = vector.broadcast %cst_26 : f32 to vector<8x48xf32>
    %62 = arith.minimumf %58, %61 : vector<8x48xf32>
    %63 = math.exp %62 : vector<8x48xf32>
    %cst_27 = arith.constant 1.000000e+00 : f32
    %64 = vector.broadcast %cst_27 : f32 to vector<8x48xf32>
    %65 = arith.subf %63, %64 : vector<8x48xf32>
    %66 = arith.select %60, %58, %65 : vector<8x48xi1>, vector<8x48xf32>
    %c0_28 = arith.constant 0 : index
    %c0_29 = arith.constant 0 : index
    %67 = vector.load %arg7[%c0_28, %c0_29] : memref<48x48xf32, #tpu.memory_space<vmem>>, vector<48x48xf32>
    %cst_30 = arith.constant dense<0.000000e+00> : vector<8x48xf32>
    %68 = tpu.matmul %66, %67, %cst_30 {dimension_numbers = #tpu.dot_dimension_numbers<[1], [0], [0], [1], [0, 0, 1, 1], [], []>} : vector<8x48xf32>, vector<48x48xf32>, vector<8x48xf32> -> vector<8x48xf32>
    %c0_31 = arith.constant 0 : index
    %c0_32 = arith.constant 0 : index
    %69 = vector.load %arg8[%c0_31, %c0_32] : memref<1x48xf32, #tpu.memory_space<vmem>>, vector<1x48xf32>
    %70 = vector.broadcast %69 : vector<1x48xf32> to vector<8x48xf32>
    %71 = arith.addf %68, %70 : vector<8x48xf32>
    %72 = tpu.iota {dimensions = array<i32: 1>} : vector<1x48xi32>
    %c4_i32 = arith.constant 4 : i32
    %73 = vector.broadcast %c4_i32 : i32 to vector<1x48xi32>
    %74 = arith.cmpi slt, %72, %73 : vector<1x48xi32>
    %c4_i32_33 = arith.constant 4 : i32
    %75 = vector.broadcast %c4_i32_33 : i32 to vector<1x48xi32>
    %76 = arith.cmpi sge, %72, %75 : vector<1x48xi32>
    %c25_i32 = arith.constant 25 : i32
    %77 = vector.broadcast %c25_i32 : i32 to vector<1x48xi32>
    %78 = arith.cmpi slt, %72, %77 : vector<1x48xi32>
    %79 = arith.andi %76, %78 : vector<1x48xi1>
    %cst_34 = arith.constant 0xFF800000 : f32
    %80 = vector.shape_cast %74 : vector<1x48xi1> to vector<1x48xi1>
    %81 = vector.broadcast %80 : vector<1x48xi1> to vector<8x48xi1>
    %82 = vector.broadcast %cst_34 : f32 to vector<8x48xf32>
    %83 = arith.select %81, %71, %82 : vector<8x48xi1>, vector<8x48xf32>
    %cst_35 = arith.constant dense<0xFF800000> : vector<8xf32>
    %84 = vector.multi_reduction <maximumf>, %83, %cst_35 [1] : vector<8x48xf32> to vector<8xf32>
    %85 = vector.shape_cast %84 : vector<8xf32> to vector<8x1xf32>
    %cst_36 = arith.constant 0xFF800000 : f32
    %86 = vector.shape_cast %79 : vector<1x48xi1> to vector<1x48xi1>
    %87 = vector.broadcast %86 : vector<1x48xi1> to vector<8x48xi1>
    %88 = vector.broadcast %cst_36 : f32 to vector<8x48xf32>
    %89 = arith.select %87, %71, %88 : vector<8x48xi1>, vector<8x48xf32>
    %cst_37 = arith.constant dense<0xFF800000> : vector<8xf32>
    %90 = vector.multi_reduction <maximumf>, %89, %cst_37 [1] : vector<8x48xf32> to vector<8xf32>
    %91 = vector.shape_cast %90 : vector<8xf32> to vector<8x1xf32>
    %92 = arith.ori %74, %79 : vector<1x48xi1>
    %cst_38 = arith.constant dense<true> : vector<1x48xi1>
    %93 = arith.xori %92, %cst_38 : vector<1x48xi1>
    %cst_39 = arith.constant 0xFF800000 : f32
    %94 = vector.shape_cast %93 : vector<1x48xi1> to vector<1x48xi1>
    %95 = vector.broadcast %94 : vector<1x48xi1> to vector<8x48xi1>
    %96 = vector.broadcast %cst_39 : f32 to vector<8x48xf32>
    %97 = arith.select %95, %71, %96 : vector<8x48xi1>, vector<8x48xf32>
    %cst_40 = arith.constant dense<0xFF800000> : vector<8xf32>
    %98 = vector.multi_reduction <maximumf>, %97, %cst_40 [1] : vector<8x48xf32> to vector<8xf32>
    %99 = vector.shape_cast %98 : vector<8xf32> to vector<8x1xf32>
    %100 = vector.shape_cast %79 : vector<1x48xi1> to vector<1x48xi1>
    %101 = vector.broadcast %100 : vector<1x48xi1> to vector<8x48xi1>
    %102 = vector.shape_cast %91 : vector<8x1xf32> to vector<8x1xf32>
    %103 = vector.broadcast %102 : vector<8x1xf32> to vector<8x48xf32>
    %104 = vector.shape_cast %99 : vector<8x1xf32> to vector<8x1xf32>
    %105 = vector.broadcast %104 : vector<8x1xf32> to vector<8x48xf32>
    %106 = arith.select %101, %103, %105 : vector<8x48xi1>, vector<8x48xf32>
    %107 = vector.shape_cast %74 : vector<1x48xi1> to vector<1x48xi1>
    %108 = vector.broadcast %107 : vector<1x48xi1> to vector<8x48xi1>
    %109 = vector.shape_cast %85 : vector<8x1xf32> to vector<8x1xf32>
    %110 = vector.broadcast %109 : vector<8x1xf32> to vector<8x48xf32>
    %111 = arith.select %108, %110, %106 : vector<8x48xi1>, vector<8x48xf32>
    %112 = arith.subf %71, %111 : vector<8x48xf32>
    %113 = math.exp %112 : vector<8x48xf32>
    %cst_41 = arith.constant 0.000000e+00 : f32
    %114 = vector.shape_cast %74 : vector<1x48xi1> to vector<1x48xi1>
    %115 = vector.broadcast %114 : vector<1x48xi1> to vector<8x48xi1>
    %116 = vector.broadcast %cst_41 : f32 to vector<8x48xf32>
    %117 = arith.select %115, %113, %116 : vector<8x48xi1>, vector<8x48xf32>
    %cst_42 = arith.constant dense<0.000000e+00> : vector<8xf32>
    %118 = vector.multi_reduction <add>, %117, %cst_42 [1] : vector<8x48xf32> to vector<8xf32>
    %119 = vector.shape_cast %118 : vector<8xf32> to vector<8x1xf32>
    %cst_43 = arith.constant 0.000000e+00 : f32
    %120 = vector.shape_cast %79 : vector<1x48xi1> to vector<1x48xi1>
    %121 = vector.broadcast %120 : vector<1x48xi1> to vector<8x48xi1>
    %122 = vector.broadcast %cst_43 : f32 to vector<8x48xf32>
    %123 = arith.select %121, %113, %122 : vector<8x48xi1>, vector<8x48xf32>
    %cst_44 = arith.constant dense<0.000000e+00> : vector<8xf32>
    %124 = vector.multi_reduction <add>, %123, %cst_44 [1] : vector<8x48xf32> to vector<8xf32>
    %125 = vector.shape_cast %124 : vector<8xf32> to vector<8x1xf32>
    %126 = arith.ori %74, %79 : vector<1x48xi1>
    %cst_45 = arith.constant dense<true> : vector<1x48xi1>
    %127 = arith.xori %126, %cst_45 : vector<1x48xi1>
    %cst_46 = arith.constant 0.000000e+00 : f32
    %128 = vector.shape_cast %127 : vector<1x48xi1> to vector<1x48xi1>
    %129 = vector.broadcast %128 : vector<1x48xi1> to vector<8x48xi1>
    %130 = vector.broadcast %cst_46 : f32 to vector<8x48xf32>
    %131 = arith.select %129, %113, %130 : vector<8x48xi1>, vector<8x48xf32>
    %cst_47 = arith.constant dense<0.000000e+00> : vector<8xf32>
    %132 = vector.multi_reduction <add>, %131, %cst_47 [1] : vector<8x48xf32> to vector<8xf32>
    %133 = vector.shape_cast %132 : vector<8xf32> to vector<8x1xf32>
    %134 = vector.shape_cast %79 : vector<1x48xi1> to vector<1x48xi1>
    %135 = vector.broadcast %134 : vector<1x48xi1> to vector<8x48xi1>
    %136 = vector.shape_cast %125 : vector<8x1xf32> to vector<8x1xf32>
    %137 = vector.broadcast %136 : vector<8x1xf32> to vector<8x48xf32>
    %138 = vector.shape_cast %133 : vector<8x1xf32> to vector<8x1xf32>
    %139 = vector.broadcast %138 : vector<8x1xf32> to vector<8x48xf32>
    %140 = arith.select %135, %137, %139 : vector<8x48xi1>, vector<8x48xf32>
    %141 = vector.shape_cast %74 : vector<1x48xi1> to vector<1x48xi1>
    %142 = vector.broadcast %141 : vector<1x48xi1> to vector<8x48xi1>
    %143 = vector.shape_cast %119 : vector<8x1xf32> to vector<8x1xf32>
    %144 = vector.broadcast %143 : vector<8x1xf32> to vector<8x48xf32>
    %145 = arith.select %142, %144, %140 : vector<8x48xi1>, vector<8x48xf32>
    %146 = tpu.reciprocal %145 {approx = true} : vector<8x48xf32> -> vector<8x48xf32>
    %147 = arith.mulf %113, %146 : vector<8x48xf32>
    %cst_48 = arith.constant 0xFF800000 : f32
    %148 = vector.shape_cast %74 : vector<1x48xi1> to vector<1x48xi1>
    %149 = vector.broadcast %148 : vector<1x48xi1> to vector<8x48xi1>
    %150 = vector.broadcast %cst_48 : f32 to vector<8x48xf32>
    %151 = arith.select %149, %147, %150 : vector<8x48xi1>, vector<8x48xf32>
    %cst_49 = arith.constant dense<0xFF800000> : vector<8xf32>
    %152 = vector.multi_reduction <maximumf>, %151, %cst_49 [1] : vector<8x48xf32> to vector<8xf32>
    %153 = vector.shape_cast %152 : vector<8xf32> to vector<8x1xf32>
    %cst_50 = arith.constant 0xFF800000 : f32
    %154 = vector.shape_cast %79 : vector<1x48xi1> to vector<1x48xi1>
    %155 = vector.broadcast %154 : vector<1x48xi1> to vector<8x48xi1>
    %156 = vector.broadcast %cst_50 : f32 to vector<8x48xf32>
    %157 = arith.select %155, %147, %156 : vector<8x48xi1>, vector<8x48xf32>
    %cst_51 = arith.constant dense<0xFF800000> : vector<8xf32>
    %158 = vector.multi_reduction <maximumf>, %157, %cst_51 [1] : vector<8x48xf32> to vector<8xf32>
    %159 = vector.shape_cast %158 : vector<8xf32> to vector<8x1xf32>
    %160 = arith.ori %74, %79 : vector<1x48xi1>
    %cst_52 = arith.constant dense<true> : vector<1x48xi1>
    %161 = arith.xori %160, %cst_52 : vector<1x48xi1>
    %cst_53 = arith.constant 0xFF800000 : f32
    %162 = vector.shape_cast %161 : vector<1x48xi1> to vector<1x48xi1>
    %163 = vector.broadcast %162 : vector<1x48xi1> to vector<8x48xi1>
    %164 = vector.broadcast %cst_53 : f32 to vector<8x48xf32>
    %165 = arith.select %163, %147, %164 : vector<8x48xi1>, vector<8x48xf32>
    %cst_54 = arith.constant dense<0xFF800000> : vector<8xf32>
    %166 = vector.multi_reduction <maximumf>, %165, %cst_54 [1] : vector<8x48xf32> to vector<8xf32>
    %167 = vector.shape_cast %166 : vector<8xf32> to vector<8x1xf32>
    %168 = vector.shape_cast %79 : vector<1x48xi1> to vector<1x48xi1>
    %169 = vector.broadcast %168 : vector<1x48xi1> to vector<8x48xi1>
    %170 = vector.shape_cast %159 : vector<8x1xf32> to vector<8x1xf32>
    %171 = vector.broadcast %170 : vector<8x1xf32> to vector<8x48xf32>
    %172 = vector.shape_cast %167 : vector<8x1xf32> to vector<8x1xf32>
    %173 = vector.broadcast %172 : vector<8x1xf32> to vector<8x48xf32>
    %174 = arith.select %169, %171, %173 : vector<8x48xi1>, vector<8x48xf32>
    %175 = vector.shape_cast %74 : vector<1x48xi1> to vector<1x48xi1>
    %176 = vector.broadcast %175 : vector<1x48xi1> to vector<8x48xi1>
    %177 = vector.shape_cast %153 : vector<8x1xf32> to vector<8x1xf32>
    %178 = vector.broadcast %177 : vector<8x1xf32> to vector<8x48xf32>
    %179 = arith.select %176, %178, %174 : vector<8x48xi1>, vector<8x48xf32>
    %180 = arith.subf %147, %179 : vector<8x48xf32>
    %181 = math.exp %180 : vector<8x48xf32>
    %cst_55 = arith.constant 0.000000e+00 : f32
    %182 = vector.shape_cast %74 : vector<1x48xi1> to vector<1x48xi1>
    %183 = vector.broadcast %182 : vector<1x48xi1> to vector<8x48xi1>
    %184 = vector.broadcast %cst_55 : f32 to vector<8x48xf32>
    %185 = arith.select %183, %181, %184 : vector<8x48xi1>, vector<8x48xf32>
    %cst_56 = arith.constant dense<0.000000e+00> : vector<8xf32>
    %186 = vector.multi_reduction <add>, %185, %cst_56 [1] : vector<8x48xf32> to vector<8xf32>
    %187 = vector.shape_cast %186 : vector<8xf32> to vector<8x1xf32>
    %cst_57 = arith.constant 0.000000e+00 : f32
    %188 = vector.shape_cast %79 : vector<1x48xi1> to vector<1x48xi1>
    %189 = vector.broadcast %188 : vector<1x48xi1> to vector<8x48xi1>
    %190 = vector.broadcast %cst_57 : f32 to vector<8x48xf32>
    %191 = arith.select %189, %181, %190 : vector<8x48xi1>, vector<8x48xf32>
    %cst_58 = arith.constant dense<0.000000e+00> : vector<8xf32>
    %192 = vector.multi_reduction <add>, %191, %cst_58 [1] : vector<8x48xf32> to vector<8xf32>
    %193 = vector.shape_cast %192 : vector<8xf32> to vector<8x1xf32>
    %194 = arith.ori %74, %79 : vector<1x48xi1>
    %cst_59 = arith.constant dense<true> : vector<1x48xi1>
    %195 = arith.xori %194, %cst_59 : vector<1x48xi1>
    %cst_60 = arith.constant 0.000000e+00 : f32
    %196 = vector.shape_cast %195 : vector<1x48xi1> to vector<1x48xi1>
    %197 = vector.broadcast %196 : vector<1x48xi1> to vector<8x48xi1>
    %198 = vector.broadcast %cst_60 : f32 to vector<8x48xf32>
    %199 = arith.select %197, %181, %198 : vector<8x48xi1>, vector<8x48xf32>
    %cst_61 = arith.constant dense<0.000000e+00> : vector<8xf32>
    %200 = vector.multi_reduction <add>, %199, %cst_61 [1] : vector<8x48xf32> to vector<8xf32>
    %201 = vector.shape_cast %200 : vector<8xf32> to vector<8x1xf32>
    %202 = vector.shape_cast %79 : vector<1x48xi1> to vector<1x48xi1>
    %203 = vector.broadcast %202 : vector<1x48xi1> to vector<8x48xi1>
    %204 = vector.shape_cast %193 : vector<8x1xf32> to vector<8x1xf32>
    %205 = vector.broadcast %204 : vector<8x1xf32> to vector<8x48xf32>
    %206 = vector.shape_cast %201 : vector<8x1xf32> to vector<8x1xf32>
    %207 = vector.broadcast %206 : vector<8x1xf32> to vector<8x48xf32>
    %208 = arith.select %203, %205, %207 : vector<8x48xi1>, vector<8x48xf32>
    %209 = vector.shape_cast %74 : vector<1x48xi1> to vector<1x48xi1>
    %210 = vector.broadcast %209 : vector<1x48xi1> to vector<8x48xi1>
    %211 = vector.shape_cast %187 : vector<8x1xf32> to vector<8x1xf32>
    %212 = vector.broadcast %211 : vector<8x1xf32> to vector<8x48xf32>
    %213 = arith.select %210, %212, %208 : vector<8x48xi1>, vector<8x48xf32>
    %214 = math.log %213 : vector<8x48xf32>
    %215 = arith.addf %179, %214 : vector<8x48xf32>
    %216 = arith.subf %147, %215 : vector<8x48xf32>
    %c0_62 = arith.constant 0 : index
    %c0_63 = arith.constant 0 : index
    %217 = vector.load %arg9[%c0_62, %c0_63] : memref<8x3xi32, #tpu.memory_space<vmem>>, vector<8x3xi32>
    %218 = vector.extract_strided_slice %217 {offsets = [0, 0], sizes = [8, 1], strides = [1, 1]} : vector<8x3xi32> to vector<8x1xi32>
    %219 = vector.extract_strided_slice %217 {offsets = [0, 1], sizes = [8, 1], strides = [1, 1]} : vector<8x3xi32> to vector<8x1xi32>
    %220 = vector.extract_strided_slice %217 {offsets = [0, 2], sizes = [8, 1], strides = [1, 1]} : vector<8x3xi32> to vector<8x1xi32>
    %c0_i32 = arith.constant 0 : i32
    %221 = vector.broadcast %c0_i32 : i32 to vector<8x1xi32>
    %222 = arith.cmpi sge, %218, %221 : vector<8x1xi32>
    %c-1_i32 = arith.constant -1 : i32
    %223 = vector.broadcast %c-1_i32 : i32 to vector<8x1xi32>
    %224 = arith.select %222, %218, %223 : vector<8x1xi1>, vector<8x1xi32>
    %c0_i32_64 = arith.constant 0 : i32
    %225 = vector.broadcast %c0_i32_64 : i32 to vector<8x1xi32>
    %226 = arith.cmpi sge, %219, %225 : vector<8x1xi32>
    %c4_i32_65 = arith.constant 4 : i32
    %227 = vector.broadcast %c4_i32_65 : i32 to vector<8x1xi32>
    %228 = arith.addi %219, %227 : vector<8x1xi32>
    %c-1_i32_66 = arith.constant -1 : i32
    %229 = vector.broadcast %c-1_i32_66 : i32 to vector<8x1xi32>
    %230 = arith.select %226, %228, %229 : vector<8x1xi1>, vector<8x1xi32>
    %c0_i32_67 = arith.constant 0 : i32
    %231 = vector.broadcast %c0_i32_67 : i32 to vector<8x1xi32>
    %232 = arith.cmpi sge, %220, %231 : vector<8x1xi32>
    %c25_i32_68 = arith.constant 25 : i32
    %233 = vector.broadcast %c25_i32_68 : i32 to vector<8x1xi32>
    %234 = arith.addi %220, %233 : vector<8x1xi32>
    %c-1_i32_69 = arith.constant -1 : i32
    %235 = vector.broadcast %c-1_i32_69 : i32 to vector<8x1xi32>
    %236 = arith.select %232, %234, %235 : vector<8x1xi1>, vector<8x1xi32>
    %237 = tpu.iota {dimensions = array<i32: 1>} : vector<8x48xi32>
    %238 = vector.broadcast %224 : vector<8x1xi32> to vector<8x48xi32>
    %239 = arith.cmpi eq, %237, %238 : vector<8x48xi32>
    %240 = vector.broadcast %230 : vector<8x1xi32> to vector<8x48xi32>
    %241 = arith.cmpi eq, %237, %240 : vector<8x48xi32>
    %242 = arith.ori %239, %241 : vector<8x48xi1>
    %243 = vector.broadcast %236 : vector<8x1xi32> to vector<8x48xi32>
    %244 = arith.cmpi eq, %237, %243 : vector<8x48xi32>
    %245 = arith.ori %242, %244 : vector<8x48xi1>
    %cst_70 = arith.constant 0.000000e+00 : f32
    %246 = vector.broadcast %cst_70 : f32 to vector<8x48xf32>
    %247 = arith.select %245, %216, %246 : vector<8x48xi1>, vector<8x48xf32>
    %cst_71 = arith.constant 0.000000e+00 : f32
    %248 = vector.shape_cast %74 : vector<1x48xi1> to vector<1x48xi1>
    %249 = vector.broadcast %248 : vector<1x48xi1> to vector<8x48xi1>
    %250 = vector.broadcast %cst_71 : f32 to vector<8x48xf32>
    %251 = arith.select %249, %247, %250 : vector<8x48xi1>, vector<8x48xf32>
    %252 = vector.shape_cast %251 : vector<8x48xf32> to vector<1x8x48xf32>
    %cst_72 = arith.constant dense<0.000000e+00> : vector<1xf32>
    %253 = vector.multi_reduction <add>, %252, %cst_72 [1, 2] : vector<1x8x48xf32> to vector<1xf32>
    %254 = vector.shape_cast %253 : vector<1xf32> to vector<1x1x1xf32>
    %255 = vector.extract %254[0, 0, 0] : f32 from vector<1x1x1xf32>
    %256 = vector.broadcast %255 : f32 to vector<1x1xf32>
    %c0_i32_73 = arith.constant 0 : i32
    %257 = vector.broadcast %c0_i32_73 : i32 to vector<8x1xi32>
    %258 = arith.cmpi sge, %218, %257 : vector<8x1xi32>
    %259 = arith.extui %258 : vector<8x1xi1> to vector<8x1xi32>
    %260 = arith.sitofp %259 : vector<8x1xi32> to vector<8x1xf32>
    %261 = vector.shape_cast %260 : vector<8x1xf32> to vector<1x8x1xf32>
    %cst_74 = arith.constant dense<0.000000e+00> : vector<1xf32>
    %262 = vector.multi_reduction <add>, %261, %cst_74 [1, 2] : vector<1x8x1xf32> to vector<1xf32>
    %263 = vector.shape_cast %262 : vector<1xf32> to vector<1x1x1xf32>
    %264 = vector.extract %263[0, 0, 0] : f32 from vector<1x1x1xf32>
    %265 = vector.broadcast %264 : f32 to vector<1x1xf32>
    %cst_75 = arith.constant 0.000000e+00 : f32
    %266 = vector.broadcast %cst_75 : f32 to vector<1x1xf32>
    %267 = arith.subf %266, %256 : vector<1x1xf32>
    %cst_76 = arith.constant 1.000000e+00 : f32
    %268 = vector.broadcast %cst_76 : f32 to vector<1x1xf32>
    %269 = arith.maximumf %265, %268 : vector<1x1xf32>
    %270 = arith.divf %267, %269 : vector<1x1xf32>
    %cst_77 = arith.constant 0.000000e+00 : f32
    %271 = vector.shape_cast %79 : vector<1x48xi1> to vector<1x48xi1>
    %272 = vector.broadcast %271 : vector<1x48xi1> to vector<8x48xi1>
    %273 = vector.broadcast %cst_77 : f32 to vector<8x48xf32>
    %274 = arith.select %272, %247, %273 : vector<8x48xi1>, vector<8x48xf32>
    %275 = vector.shape_cast %274 : vector<8x48xf32> to vector<1x8x48xf32>
    %cst_78 = arith.constant dense<0.000000e+00> : vector<1xf32>
    %276 = vector.multi_reduction <add>, %275, %cst_78 [1, 2] : vector<1x8x48xf32> to vector<1xf32>
    %277 = vector.shape_cast %276 : vector<1xf32> to vector<1x1x1xf32>
    %278 = vector.extract %277[0, 0, 0] : f32 from vector<1x1x1xf32>
    %279 = vector.broadcast %278 : f32 to vector<1x1xf32>
    %c0_i32_79 = arith.constant 0 : i32
    %280 = vector.broadcast %c0_i32_79 : i32 to vector<8x1xi32>
    %281 = arith.cmpi sge, %219, %280 : vector<8x1xi32>
    %282 = arith.extui %281 : vector<8x1xi1> to vector<8x1xi32>
    %283 = arith.sitofp %282 : vector<8x1xi32> to vector<8x1xf32>
    %284 = vector.shape_cast %283 : vector<8x1xf32> to vector<1x8x1xf32>
    %cst_80 = arith.constant dense<0.000000e+00> : vector<1xf32>
    %285 = vector.multi_reduction <add>, %284, %cst_80 [1, 2] : vector<1x8x1xf32> to vector<1xf32>
    %286 = vector.shape_cast %285 : vector<1xf32> to vector<1x1x1xf32>
    %287 = vector.extract %286[0, 0, 0] : f32 from vector<1x1x1xf32>
    %288 = vector.broadcast %287 : f32 to vector<1x1xf32>
    %cst_81 = arith.constant 0.000000e+00 : f32
    %289 = vector.broadcast %cst_81 : f32 to vector<1x1xf32>
    %290 = arith.subf %289, %279 : vector<1x1xf32>
    %cst_82 = arith.constant 1.000000e+00 : f32
    %291 = vector.broadcast %cst_82 : f32 to vector<1x1xf32>
    %292 = arith.maximumf %288, %291 : vector<1x1xf32>
    %293 = arith.divf %290, %292 : vector<1x1xf32>
    %294 = arith.addf %270, %293 : vector<1x1xf32>
    %295 = arith.ori %74, %79 : vector<1x48xi1>
    %cst_83 = arith.constant dense<true> : vector<1x48xi1>
    %296 = arith.xori %295, %cst_83 : vector<1x48xi1>
    %cst_84 = arith.constant 0.000000e+00 : f32
    %297 = vector.shape_cast %296 : vector<1x48xi1> to vector<1x48xi1>
    %298 = vector.broadcast %297 : vector<1x48xi1> to vector<8x48xi1>
    %299 = vector.broadcast %cst_84 : f32 to vector<8x48xf32>
    %300 = arith.select %298, %247, %299 : vector<8x48xi1>, vector<8x48xf32>
    %301 = vector.shape_cast %300 : vector<8x48xf32> to vector<1x8x48xf32>
    %cst_85 = arith.constant dense<0.000000e+00> : vector<1xf32>
    %302 = vector.multi_reduction <add>, %301, %cst_85 [1, 2] : vector<1x8x48xf32> to vector<1xf32>
    %303 = vector.shape_cast %302 : vector<1xf32> to vector<1x1x1xf32>
    %304 = vector.extract %303[0, 0, 0] : f32 from vector<1x1x1xf32>
    %305 = vector.broadcast %304 : f32 to vector<1x1xf32>
    %c0_i32_86 = arith.constant 0 : i32
    %306 = vector.broadcast %c0_i32_86 : i32 to vector<8x1xi32>
    %307 = arith.cmpi sge, %220, %306 : vector<8x1xi32>
    %308 = arith.extui %307 : vector<8x1xi1> to vector<8x1xi32>
    %309 = arith.sitofp %308 : vector<8x1xi32> to vector<8x1xf32>
    %310 = vector.shape_cast %309 : vector<8x1xf32> to vector<1x8x1xf32>
    %cst_87 = arith.constant dense<0.000000e+00> : vector<1xf32>
    %311 = vector.multi_reduction <add>, %310, %cst_87 [1, 2] : vector<1x8x1xf32> to vector<1xf32>
    %312 = vector.shape_cast %311 : vector<1xf32> to vector<1x1x1xf32>
    %313 = vector.extract %312[0, 0, 0] : f32 from vector<1x1x1xf32>
    %314 = vector.broadcast %313 : f32 to vector<1x1xf32>
    %cst_88 = arith.constant 0.000000e+00 : f32
    %315 = vector.broadcast %cst_88 : f32 to vector<1x1xf32>
    %316 = arith.subf %315, %305 : vector<1x1xf32>
    %cst_89 = arith.constant 1.000000e+00 : f32
    %317 = vector.broadcast %cst_89 : f32 to vector<1x1xf32>
    %318 = arith.maximumf %314, %317 : vector<1x1xf32>
    %319 = arith.divf %316, %318 : vector<1x1xf32>
    %320 = arith.addf %294, %319 : vector<1x1xf32>
    %321 = vector.shape_cast %320 : vector<1x1xf32> to vector<1x1xf32>
    %322 = vector.broadcast %321 : vector<1x1xf32> to vector<8x1xf32>
    %cst_90 = arith.constant 0.000000e+00 : f32
    %323 = vector.broadcast %cst_90 : f32 to vector<8x79xf32>
    %324 = tpu.concatenate %147, %322, %323 in 1 : vector<8x48xf32>, vector<8x1xf32>, vector<8x79xf32> -> vector<8x128xf32>
    %c0_91 = arith.constant 0 : index
    %c0_92 = arith.constant 0 : index
    %325 = vector.load %arg10[%c0_91, %c0_92] : memref<8x128xf32, #tpu.memory_space<vmem>>, vector<8x128xf32>
    tpu.vector_store %arg10[%c0_91, %c0_92], %324 {strides = array<i32>} : memref<8x128xf32, #tpu.memory_space<vmem>>, vector<8x128xf32>,
    return
  }
}

</mosaic_0001>

<bundles_post_ra>
// kernel: tpu_custom_call.1
= control target key start
LH: loop header
LB: loop body
LE: loop exit
PB: predicated region body
PF: predicated region fallthrough
CT: control target
= control target key end

     0   :  { %s3826_s0 = inlined_call_operand.vmem [shape: f32[8,2048], index: 0, kind: input, shape index: {}]   ;;  %s3827_s1 = inlined_call_operand.vmem [shape: f32[1,2048], index: 1, kind: input, shape index: {}]   ;;  %s3828_s2 = inlined_call_operand.vmem [shape: f32[1,2048], index: 2, kind: input, shape index: {}]   ;;  %s3829_s3 = inlined_call_operand.vmem [shape: bf16[2048,48], index: 3, kind: input, shape index: {}]   ;;  %s3830_s4 = inlined_call_operand.vmem [shape: f32[1,48], index: 4, kind: input, shape index: {}]   ;;  %s3831_s5 = inlined_call_operand.vmem [shape: f32[1,48], index: 5, kind: input, shape index: {}]   ;;  %s3832_s6 = inlined_call_operand.vmem [shape: f32[1,48], index: 6, kind: input, shape index: {}]   ;;  %s3833_s7 = inlined_call_operand.vmem [shape: f32[48,48], index: 7, kind: input, shape index: {}]   ;;  %s3834_s8 = inlined_call_operand.vmem [shape: f32[1,48], index: 8, kind: input, shape index: {}]   ;;  %s3835_s9 = inlined_call_operand.vmem [shape: s32[8,3], index: 9, kind: input, shape index: {}]   ;;  %s3836_s10 = inlined_call_operand.hbm [shape: f32[8,128], index: 10, kind: output, shape index: {}]  }
   0x1   :  { %v2689_v0 = vld [vmem:[%s3829_s3 + $0x40] sm:$0xff]   ;;  %v2693_v4 = vld [vmem:[%s3829_s3 + $0x48] sm:$0xff]   ;;  %v2697_v8 = vld [vmem:[%s3829_s3 + $0x50] sm:$0xff]  }
   0x2   :  { %v2690_v1 = vld [vmem:[%s3829_s3 + $0xc0] sm:$0xff]   ;;  %2456 = vmatprep.subr.bf16.mxu0 %v2689_v0  ;;  %v2694_v5 = vld [vmem:[%s3829_s3 + $0xc8] sm:$0xff]   ;;  %v2698_v9 = vld [vmem:[%s3829_s3 + $0xd0] sm:$0xff]  }
   0x3   :  { %v2691_v2 = vld [vmem:[%s3829_s3] sm:$0xff]   ;;  %2478 = vmatprep.subr.bf16.mxu1 %v2690_v1  ;;  %v2695_v6 = vld [vmem:[%s3829_s3 + $0x8] sm:$0xff]   ;;  %v2699_v10 = vld [vmem:[%s3829_s3 + $0x10] sm:$0xff]  }
   0x4   :  { %v2692_v3 = vld [vmem:[%s3829_s3 + $0x80] sm:$0xff]   ;;  %2457 = vmatpush3.bf16.msra.mxu0 %v2691_v2  ;;  %v2696_v7 = vld [vmem:[%s3829_s3 + $0x88] sm:$0xff]   ;;  %v2700_v11 = vld [vmem:[%s3829_s3 + $0x90] sm:$0xff]  }
   0x5   :  { %2479 = vmatpush3.bf16.msra.mxu1 %v2692_v3  ;;  %2458 = vmatprep.subr.bf16.mxu0 %v2693_v4  ;;  %v2701_v12 = vld [vmem:[%s3829_s3 + $0x58] sm:$0xff]   ;;  %v2705_v16 = vld [vmem:[%s3829_s3 + $0x60] sm:$0xff]   ;;  %v2709_v20 = vld [vmem:[%s3829_s3 + $0x68] sm:$0xff]  }
   0x6   :  { %2480 = vmatprep.subr.bf16.mxu1 %v2694_v5  ;;  %v2702_v13 = vld [vmem:[%s3829_s3 + $0xd8] sm:$0xff]   ;;  %v2706_v17 = vld [vmem:[%s3829_s3 + $0xe0] sm:$0xff]   ;;  %v2710_v21 = vld [vmem:[%s3829_s3 + $0xe8] sm:$0xff]  }
   0x7   :  { %v2703_v14 = vld [vmem:[%s3829_s3 + $0x18] sm:$0xff]   ;;  %v2707_v18 = vld [vmem:[%s3829_s3 + $0x20] sm:$0xff]   ;;  %v2711_v22 = vld [vmem:[%s3829_s3 + $0x28] sm:$0xff]  }
   0x8   :  { %2459 = vmatpush3.bf16.msra.mxu0 %v2695_v6  ;;  %v2704_v15 = vld [vmem:[%s3829_s3 + $0x98] sm:$0xff]   ;;  %v2708_v19 = vld [vmem:[%s3829_s3 + $0xa0] sm:$0xff]   ;;  %v2712_v23 = vld [vmem:[%s3829_s3 + $0xa8] sm:$0xff]  }
   0x9   :  { %2481 = vmatpush3.bf16.msra.mxu1 %v2696_v7  ;;  %2460 = vmatprep.subr.bf16.mxu0 %v2697_v8  ;;  %v2713_v24 = vld [vmem:[%s3829_s3 + $0x70] sm:$0xff]   ;;  %v2717_v28 = vld [vmem:[%s3829_s3 + $0x78] sm:$0xff]   ;;  %v3055_v32 = vld [vmem:[%s3826_s0 + $0x8] sm:$0xff] }
   0xa   :  { %2482 = vmatprep.subr.bf16.mxu1 %v2698_v9  ;;  %v2714_v25 = vld [vmem:[%s3829_s3 + $0xf0] sm:$0xff]   ;;  %v2718_v29 = vld [vmem:[%s3829_s3 + $0xf8] sm:$0xff]   ;;  %v59_v33 = vrot.slane %v3055_v32, 4  ;;  %v167_v34 = vmul.f32 %v3055_v32, %v3055_v32  ;;  %v2721_v38 = vld [vmem:[%s3829_s3 + $0x140] sm:$0xff]  }
   0xb   :  { %v2715_v26 = vld [vmem:[%s3829_s3 + $0x30] sm:$0xff]   ;;  %v2719_v30 = vld [vmem:[%s3829_s3 + $0x38] sm:$0xff]   ;;  %v2722_v41 = vld [vmem:[%s3829_s3 + $0x1c0] sm:$0xff]  }
   0xc   :  { %2461 = vmatpush3.bf16.msra.mxu0 %v2699_v10  ;;  %v2716_v27 = vld [vmem:[%s3829_s3 + $0xb0] sm:$0xff]   ;;  %v2720_v31 = vld [vmem:[%s3829_s3 + $0xb8] sm:$0xff]   ;;  %v60_v39 = vadd.f32 %v59_v33, %v3055_v32  ;;  %v188_v40 = vrot.slane %v167_v34, 4  ;;  %v3078_v42 = vld [vmem:[%s3826_s0] sm:$0xff] }
   0xd   :  { %2483 = vmatpush3.bf16.msra.mxu1 %v2700_v11  ;;  %2462 = vmatprep.subr.bf16.mxu0 %v2701_v12  ;;  %v3063_v35 = vld [vmem:[%s3826_s0 + $0x18] sm:$0xff]  ;;  %v3083_v43 = vld [vmem:[%s3826_s0 + $0x10] sm:$0xff]  ;;  %v53_v46 = vrot.slane %v3078_v42, 4  ;;  %v166_v47 = vmul.f32 %v3078_v42, %v3078_v42 }
   0xe   :  { %2484 = vmatprep.subr.bf16.mxu1 %v2702_v13  ;;  %v71_v36 = vrot.slane %v3063_v35, 4  ;;  %v169_v37 = vmul.f32 %v3063_v35, %v3063_v35  ;;  %v61_v48 = vrot.slane %v60_v39, 2  ;;  %v189_v49 = vadd.f32 %v188_v40, %v167_v34 }
   0xf   :  { %v65_v50 = vrot.slane %v3083_v43, 4  ;;  %v168_v51 = vmul.f32 %v3083_v43, %v3083_v43  ;;  %v54_v54 = vadd.f32 %v53_v46, %v3078_v42  ;;  %v182_v55 = vrot.slane %v166_v47, 4 }
  0x10   :  { %2463 = vmatpush3.bf16.msra.mxu0 %v2703_v14  ;;  %v72_v44 = vadd.f32 %v71_v36, %v3063_v35  ;;  %v200_v45 = vrot.slane %v169_v37, 4  ;;  %v62_v56 = vadd.f32 %v61_v48, %v60_v39  ;;  %v190_v57 = vrot.slane %v189_v49, 2 }
  0x11   :  { %2485 = vmatpush3.bf16.msra.mxu1 %v2704_v15  ;;  %2464 = vmatprep.subr.bf16.mxu0 %v2705_v16  ;;  %v66_v58 = vadd.f32 %v65_v50, %v3083_v43  ;;  %v194_v59 = vrot.slane %v168_v51, 4  ;;  %v55_v62 = vrot.slane %v54_v54, 2  ;;  %v183_v63 = vadd.f32 %v182_v55, %v166_v47 }
  0x12   :  { %2486 = vmatprep.subr.bf16.mxu1 %v2706_v17  ;;  %v73_v52 = vrot.slane %v72_v44, 2  ;;  %v201_v53 = vadd.f32 %v200_v45, %v169_v37  ;;  %v63_v0 = vrot.slane %v62_v56, 1  ;;  %v191_v1 = vadd.f32 %v190_v57, %v189_v49  ;;  %v3107_v57 = vld [vmem:[%s3827_s1] sm:$0xff] }
  0x13   :  { %v67_v2 = vrot.slane %v66_v58, 2  ;;  %v195_v3 = vadd.f32 %v194_v59, %v168_v51  ;;  %v56_v6 = vadd.f32 %v55_v62, %v54_v54  ;;  %v184_v7 = vrot.slane %v183_v63, 2 }
  0x14   :  { %2465 = vmatpush3.bf16.msra.mxu0 %v2707_v18  ;;  %v74_v60 = vadd.f32 %v73_v52, %v72_v44  ;;  %v202_v61 = vrot.slane %v201_v53, 2  ;;  %v64_v8 = vadd.f32 %v63_v0, %v62_v56  ;;  %v192_v9 = vrot.slane %v191_v1, 1 }
  0x15   :  { %2487 = vmatpush3.bf16.msra.mxu1 %v2708_v19  ;;  %2466 = vmatprep.subr.bf16.mxu0 %v2709_v20  ;;  %v68_v10 = vadd.f32 %v67_v2, %v66_v58  ;;  %v196_v11 = vrot.slane %v195_v3, 2  ;;  %v57_v14 = vrot.slane %v56_v6, 1  ;;  %v185_v15 = vadd.f32 %v184_v7, %v183_v63 }
  0x16   :  { %2488 = vmatprep.subr.bf16.mxu1 %v2710_v21  ;;  %v75_v4 = vrot.slane %v74_v60, 1  ;;  %v203_v5 = vadd.f32 %v202_v61, %v201_v53  ;;  %v151_v16 = vmul.f32 0.125, %v64_v8  ;;  %v193_v17 = vadd.f32 %v192_v9, %v191_v1 }
  0x17   :  { %v69_v18 = vrot.slane %v68_v10, 1  ;;  %v197_v19 = vadd.f32 %v196_v11, %v195_v3  ;;  %v410_v36 = vlaneseq }
  0x18   :  { %2467 = vmatpush3.bf16.msra.mxu0 %v2711_v22  ;;  %v76_v12 = vadd.f32 %v75_v4, %v74_v60  ;;  %v204_v13 = vrot.slane %v203_v5, 1  ;;  %v58_v22 = vadd.f32 %v57_v14, %v56_v6  ;;  %v343_v59 = vsub.f32 %v3055_v32, %v151_v16  ;;  %v3116_v60 = vld [vmem:[%s3828_s2] sm:$0xff]  ;;  %v3147_v14 = vld [vmem:[%s3826_s0 + $0x28] sm:$0xff] }
  0x19   :  { %2489 = vmatpush3.bf16.msra.mxu1 %v2712_v23  ;;  %2468 = vmatprep.subr.bf16.mxu0 %v2713_v24  ;;  %v186_v23 = vrot.slane %v185_v15, 1  ;;  %v279_v24 = vmul.f32 0.125, %v193_v17  ;;  %v198_v34 = vrot.slane %v197_v19, 1  ;;  %v3099_v50 = vshrl.u32 %v410_v36, 7 }
  0x1a   :  { %2490 = vmatprep.subr.bf16.mxu1 %v2714_v25  ;;  %v153_v20 = vmul.f32 0.125, %v76_v12  ;;  %v205_v21 = vadd.f32 %v204_v13, %v203_v5  ;;  %v295_v25 = vmul.f32 %v151_v16, %v151_v16  ;;  %v171_v17 = vmul.f32 %v3147_v14, %v3147_v14 }
  0x1b   :  { %v3102_v55 = vsub.s32 1, %v3099_v50  ;;  %v3110_v58 = vsub.s32 3, %v3099_v50  ;;  %v3122_v63 = vsub.s32 0, %v3099_v50  ;;  %v3127_v2 = vsub.s32 2, %v3099_v50 }
  0x1c   :  { %2469 = vmatpush3.bf16.msra.mxu0 %v2715_v26  ;;  %v70_v26 = vadd.f32 %v69_v18, %v68_v10  ;;  %v345_v61 = vsub.f32 %v3063_v35, %v153_v20  ;;  %v3155_v18 = vld [vmem:[%s3826_s0 + $0x38] sm:$0xff] }
  0x1d   :  { %2491 = vmatpush3.bf16.msra.mxu1 %v2716_v27  ;;  %2470 = vmatprep.subr.bf16.mxu0 %v2717_v28  ;;  %v281_v27 = vmul.f32 0.125, %v205_v21  ;;  %v297_v28 = vmul.f32 %v153_v20, %v153_v20  ;;  %v417_v62 = vrot.slane %v3107_v57, %v3102_v55  ;;  %v425_v1 = vrot.slane %v3107_v57, %v3110_v58 }
  0x1e   :  { %2492 = vmatprep.subr.bf16.mxu1 %v2718_v29  ;;  %v150_v29 = vmul.f32 0.125, %v58_v22  ;;  %v3094_v33 = vmul.f32 0.125, %v70_v26  ;;  %v517_v4 = vrot.slane %v3116_v60, %v3102_v55  ;;  %v525_v6 = vrot.slane %v3116_v60, %v3110_v58 }
  0x1f   :  { %v313_v37 = vsub.f32 %v281_v27, %v297_v28  ;;  %v413_v8 = vrot.slane %v3107_v57, %v3122_v63  ;;  %v513_v12 = vrot.slane %v3116_v60, %v3122_v63  ;;  %v421_v13 = vrot.slane %v3107_v57, %v3127_v2 }
  0x20   :  { %2471 = vmatpush3.bf16.msra.mxu0 %v2719_v30  ;;  %v311_v30 = vsub.f32 %v279_v24, %v295_v25  ;;  %v296_v44 = vmul.f32 %v3094_v33, %v3094_v33  ;;  %v342_v35 = vsub.f32 %v3078_v42, %v150_v29  ;;  %v344_v9 = vsub.f32 %v3083_v43, %v3094_v33 }
  0x21   :  { %2493 = vmatpush3.bf16.msra.mxu1 %v2720_v31  ;;  %2500 = vmatprep.subr.bf16.mxu0 %v2721_v38  ;;  %v187_v31 = vadd.f32 %v186_v23, %v185_v15  ;;  %v294_v38 = vmul.f32 %v150_v29, %v150_v29  ;;  %v329_v45 = vmax.f32 %v313_v37, 0.0  ;;  %v521_v42 = vrot.slane %v3116_v60, %v3127_v2 }
  0x22   :  { %2522 = vmatprep.subr.bf16.mxu1 %v2722_v41  ;;  %v327_v39 = vmax.f32 %v311_v30, 0.0  ;;  %v199_v41 = vadd.f32 %v198_v34, %v197_v19  ;;  %v83_v43 = vrot.slane %v3147_v14, 4  ;;  %v3160_v19 = vld [vmem:[%s3826_s0 + $0x20] sm:$0xff]  ;;  %v95_v22 = vrot.slane %v3155_v18, 4 }
  0x23   :  { %v278_v40 = vmul.f32 0.125, %v187_v31  ;;  %v361_v49 = vadd.f32 1e-05, %v329_v45  ;;  %v173_v23 = vmul.f32 %v3155_v18, %v3155_v18  ;;  %v77_v24 = vrot.slane %v3160_v19, 4  ;;  %v2723_v30 = vld [vmem:[%s3829_s3 + $0x100] sm:$0xff]  }
  0x24   :  { %v359_v46 = vadd.f32 1e-05, %v327_v39  ;;  %v280_v48 = vmul.f32 0.125, %v199_v41  ;;  %v84_v28 = vadd.f32 %v83_v43, %v3147_v14  ;;  %v212_v31 = vrot.slane %v171_v17, 4  ;;  %v2725_v39 = vld [vmem:[%s3829_s3 + $0x148] sm:$0xff]  }
  0x25   :  { %v310_v47 = vsub.f32 %v278_v40, %v294_v38  ;;  %v96_v33 = vadd.f32 %v95_v22, %v3155_v18  ;;  %v224_v34 = vrot.slane %v173_v23, 4  ;;  %v78_v41 = vadd.f32 %v77_v24, %v3160_v19 }
  0x26   :  { %2817 = vrsqrt.f32 %v359_v46  ;;  %v312_v52 = vsub.f32 %v280_v48, %v296_v44  ;;  %v85_v40 = vrot.slane %v84_v28, 2  ;;  %v2724_v44 = vld [vmem:[%s3829_s3 + $0x180] sm:$0xff]   ;;  %v213_v45 = vadd.f32 %v212_v31, %v171_v17 }
  0x27   :  { %v326_v51 = vmax.f32 %v310_v47, 0.0  ;;  %2819 = vrsqrt.f32 %v361_v49  ;;  %v97_v46 = vrot.slane %v96_v33, 2  ;;  %v225_v47 = vadd.f32 %v224_v34, %v173_v23  ;;  %v3183_v49 = vld [vmem:[%s3826_s0 + $0x30] sm:$0xff] }
  0x28   :  { %v328_v54 = vmax.f32 %v312_v52, 0.0  ;;  %v170_v48 = vmul.f32 %v3160_v19, %v3160_v19 }
  0x29   :  { %v358_v53 = vadd.f32 1e-05, %v326_v51 }
  0x2a   :  { %v360_v56 = vadd.f32 1e-05, %v328_v54  ;;  %v86_v54 = vadd.f32 %v85_v40, %v84_v28 }
  0x2b   :  { %2821 = vrsqrt.f32 %v358_v53  ;;  %v2726_v53 = vld [vmem:[%s3829_s3 + $0x1c8] sm:$0xff]  }
  0x2c   :  { %2823 = vrsqrt.f32 %v360_v56  ;;  %v79_v56 = vrot.slane %v78_v41, 2 }
  0x30   :  { %v2818_v0 = vpop.eup %2817 }
  0x31   :  { %v2820_v32 = vpop.eup %2819  ;;  %v391_v3 = vmul.f32 %v2818_v0, %v343_v59  ;;  %v2727_v59 = vld [vmem:[%s3829_s3 + $0x108] sm:$0xff]   ;;  %v226_v0 = vrot.slane %v225_v47, 2 }
  0x32   :  { %v393_v5 = vmul.f32 %v2820_v32, %v345_v61  ;;  %v214_v61 = vrot.slane %v213_v45, 2 }
  0x33   :  { %v491_v7 = vmul.f32 %v417_v62, %v391_v3  ;;  %v98_v62 = vadd.f32 %v97_v46, %v96_v33  ;;  %v87_v3 = vrot.slane %v86_v54, 1  ;;  %v2734_v33 = vld [vmem:[%s3829_s3 + $0x1d8] sm:$0xff]  }
  0x34   :  { %v493_v11 = vmul.f32 %v425_v1, %v393_v5  ;;  %v206_v1 = vrot.slane %v170_v48, 4  ;;  %v2728_v5 = vld [vmem:[%s3829_s3 + $0x188] sm:$0xff]  }
  0x35   :  { %v2822_v10 = vpop.eup %2821  ;;  %v591_v15 = vadd.f32 %v517_v4, %v491_v7  ;;  %v80_v4 = vadd.f32 %v79_v56, %v78_v41  ;;  %v99_v7 = vrot.slane %v98_v62, 1 }
  0x36   :  { %v390_v16 = vmul.f32 %v2822_v10, %v342_v35  ;;  %v2824_v20 = vpop.eup %2823  ;;  %v593_v21 = vadd.f32 %v525_v6, %v493_v11  ;;  %v89_v35 = vrot.slane %v3183_v49, 4  ;;  %v215_v6 = vadd.f32 %v214_v61, %v213_v45  ;;  %v2729_v10 = vld [vmem:[%s3829_s3 + $0x150] sm:$0xff]   ;;  %v2738_v61 = vld [vmem:[%s3829_s3 + $0x1e0] sm:$0xff]  }
  0x37   :  { %v607_v25 = vpack.c.bf16 %v591_v15, %v591_v15  ;;  %v392_v27 = vmul.f32 %v2824_v20, %v344_v9  ;;  %v207_v9 = vadd.f32 %v206_v1, %v170_v48  ;;  %v88_v11 = vadd.f32 %v87_v3, %v86_v54  ;;  %v2730_v15 = vld [vmem:[%s3829_s3 + $0x1d0] sm:$0xff]   ;;  %v2741_v3 = vld [vmem:[%s3829_s3 + $0x168] sm:$0xff]  }
  0x38   :  { %v490_v26 = vmul.f32 %v413_v8, %v390_v16  ;;  %v609_v29 = vpack.c.bf16 %v593_v21, %v593_v21  ;;  %v227_v8 = vadd.f32 %v226_v0, %v225_v47  ;;  %v216_v16 = vrot.slane %v215_v6, 1  ;;  %v2731_v21 = vld [vmem:[%s3829_s3 + $0x110] sm:$0xff]   ;;  %v2736_v47 = vld [vmem:[%s3829_s3 + $0x198] sm:$0xff]  }
  0x39   :  { %1685 = vmatprep.mubr.bf16.mxu0 %v607_v25  ;;  %v492_v38 = vmul.f32 %v421_v13, %v392_v27  ;;  %v90_v13 = vadd.f32 %v89_v35, %v3183_v49  ;;  %v100_v43 = vadd.f32 %v99_v7, %v98_v62  ;;  %v208_v20 = vrot.slane %v207_v9, 2  ;;  %v2733_v27 = vld [vmem:[%s3829_s3 + $0x158] sm:$0xff]  }
  0x3a   :  { %v590_v37 = vadd.f32 %v513_v12, %v490_v26  ;;  %1725 = vmatprep.mubr.bf16.mxu1 %v609_v29  ;;  %v81_v12 = vrot.slane %v80_v4, 1  ;;  %v228_v17 = vrot.slane %v227_v8, 1  ;;  %v3207_v22 = vmul.f32 0.125, %v88_v11  ;;  %v2732_v26 = vld [vmem:[%s3829_s3 + $0x190] sm:$0xff]   ;;  %v2742_v11 = vld [vmem:[%s3829_s3 + $0x1e8] sm:$0xff]  }
  0x3b   :  { %v592_v52 = vadd.f32 %v521_v42, %v492_v38  ;;  %v172_v42 = vmul.f32 %v3183_v49, %v3183_v49  ;;  %v91_v24 = vrot.slane %v90_v13, 2  ;;  %v217_v28 = vadd.f32 %v216_v16, %v215_v6 }
  0x3c   :  { %v606_v51 = vpack.c.bf16 %v590_v37, %v590_v37  ;;  %v82_v23 = vadd.f32 %v81_v12, %v80_v4  ;;  %v3215_v29 = vmul.f32 0.125, %v100_v43  ;;  %v209_v31 = vadd.f32 %v208_v20, %v207_v9  ;;  %v2740_v9 = vld [vmem:[%s3829_s3 + $0x1a0] sm:$0xff]   ;;  %v2744_v43 = vld [vmem:[%s3829_s3 + $0x1a8] sm:$0xff]  }
  0x3d   :  { %v608_v32 = vpack.c.bf16 %v592_v52, %v592_v52  ;;  %v218_v25 = vrot.slane %v172_v42, 4  ;;  %v299_v34 = vmul.f32 %v3207_v22, %v3207_v22  ;;  %v92_v38 = vadd.f32 %v91_v24, %v90_v13  ;;  %v2743_v13 = vld [vmem:[%s3829_s3 + $0x128] sm:$0xff]   ;;  %v2747_v24 = vld [vmem:[%s3829_s3 + $0x130] sm:$0xff]  }
  0x3e   :  { %1686 = vmatmul.mubr.bf16.vlgmr.msra.gmra.mrb[0].mxu0 %v606_v51  ;;  %v3222_v37 = vmul.f32 0.125, %v82_v23  ;;  %v283_v40 = vmul.f32 0.125, %v217_v28  ;;  %v210_v45 = vrot.slane %v209_v31, 1  ;;  %v347_v28 = vsub.f32 %v3147_v14, %v3207_v22  ;;  %v2751_v22 = vld [vmem:[%s3829_s3 + $0x138] sm:$0xff]  }
  0x3f   :  { %2501 = vmatpush3.bf16.msra.mxu0 %v2723_v30  ;;  %1726 = vmatmul.mubr.bf16.vlgmr.msra.gmra.mrb[0].mxu1 %v608_v32  ;;  %v229_v30 = vadd.f32 %v228_v17, %v227_v8  ;;  %v93_v46 = vrot.slane %v92_v38, 1  ;;  %v219_v52 = vadd.f32 %v218_v25, %v172_v42  ;;  %v2739_v32 = vld [vmem:[%s3829_s3 + $0x120] sm:$0xff]   ;;  %v3258_v42 = vsub.s32 5, %v3099_v50  ;;  %v2745_v17 = vld [vmem:[%s3829_s3 + $0x170] sm:$0xff]  }
  0x40   :  { %2502 = vmatprep.subr.bf16.mxu0 %v2725_v39  ;;  %2523 = vmatpush3.bf16.msra.mxu1 %v2724_v44  ;;  %v2735_v39 = vld [vmem:[%s3829_s3 + $0x118] sm:$0xff]   ;;  %v301_v44 = vmul.f32 %v3215_v29, %v3215_v29  ;;  %v315_v48 = vsub.f32 %v283_v40, %v299_v34  ;;  %v211_v54 = vadd.f32 %v210_v45, %v209_v31  ;;  %v3275_v25 = vsub.s32 7, %v3099_v50  ;;  %v2753_v40 = vld [vmem:[%s3829_s3 + $0x240] sm:$0xff]  }
  0x41   :  { %2524 = vmatprep.subr.bf16.mxu1 %v2726_v53  ;;  %v285_v41 = vmul.f32 0.125, %v229_v30  ;;  %v2737_v53 = vld [vmem:[%s3829_s3 + $0x160] sm:$0xff]   ;;  %v298_v56 = vmul.f32 %v3222_v37, %v3222_v37  ;;  %v220_v1 = vrot.slane %v219_v52, 2  ;;  %v2748_v30 = vld [vmem:[%s3829_s3 + $0x1b0] sm:$0xff]   ;;  %v349_v31 = vsub.f32 %v3155_v18, %v3215_v29  ;;  %v2750_v34 = vld [vmem:[%s3829_s3 + $0x1f8] sm:$0xff]  }
  0x42   :  { %v331_v62 = vmax.f32 %v315_v48, 0.0  ;;  %v282_v4 = vmul.f32 0.125, %v211_v54  ;;  %v441_v18 = vrot.slane %v3107_v57, %v3275_v25  ;;  %v533_v45 = vrot.slane %v3116_v60, %v3258_v42  ;;  %v2754_v54 = vld [vmem:[%s3829_s3 + $0x2c0] sm:$0xff]  }
  0x43   :  { %2503 = vmatpush3.bf16.msra.mxu0 %v2727_v59  ;;  %v317_v51 = vsub.f32 %v285_v41, %v301_v44  ;;  %v94_v59 = vadd.f32 %v93_v46, %v92_v38  ;;  %v221_v7 = vadd.f32 %v220_v1, %v219_v52  ;;  %v433_v38 = vrot.slane %v3107_v57, %v3258_v42  ;;  %v2752_v46 = vld [vmem:[%s3829_s3 + $0x1b8] sm:$0xff]  }
  0x44   :  { %2504 = vmatprep.subr.bf16.mxu0 %v2729_v10  ;;  %2525 = vmatpush3.bf16.msra.mxu1 %v2728_v5  ;;  %v363_v5 = vadd.f32 1e-05, %v331_v62  ;;  %v314_v8 = vsub.f32 %v282_v4, %v298_v56  ;;  %v541_v48 = vrot.slane %v3116_v60, %v3275_v25  ;;  %v3321_v56 = vld [vmem:[%s3826_s0 + $0x48] sm:$0xff] }
  0x45   :  { %2526 = vmatprep.subr.bf16.mxu1 %v2730_v15  ;;  %v333_v0 = vmax.f32 %v317_v51, 0.0  ;;  %v3246_v35 = vmul.f32 0.125, %v94_v59  ;;  %v222_v10 = vrot.slane %v221_v7, 1  ;;  %v346_v51 = vsub.f32 %v3160_v19, %v3222_v37 }
  0x46   :  { %2825 = vrsqrt.f32 %v363_v5  ;;  %v330_v12 = vmax.f32 %v314_v8, 0.0  ;;  %v107_v37 = vrot.slane %v3321_v56, 4  ;;  %v3342_v8 = vld [vmem:[%s3826_s0 + $0x40] sm:$0xff] }
  0x47   :  { %2505 = vmatpush3.bf16.msra.mxu0 %v2731_v21  ;;  %v365_v6 = vadd.f32 1e-05, %v333_v0  ;;  %v223_v15 = vadd.f32 %v222_v10, %v221_v7  ;;  %v300_v16 = vmul.f32 %v3246_v35, %v3246_v35  ;;  %v2746_v21 = vld [vmem:[%s3829_s3 + $0x1f0] sm:$0xff]  }
  0x48   :  { %2506 = vmatprep.subr.bf16.mxu0 %v2733_v27  ;;  %2527 = vmatpush3.bf16.msra.mxu1 %v2732_v26  ;;  %v362_v20 = vadd.f32 1e-05, %v330_v12  ;;  %v2749_v27 = vld [vmem:[%s3829_s3 + $0x178] sm:$0xff]  }
  0x49   :  { %2528 = vmatprep.subr.bf16.mxu1 %v2734_v33  ;;  %2827 = vrsqrt.f32 %v365_v6  ;;  %v284_v23 = vmul.f32 0.125, %v223_v15  ;;  %v108_v6 = vadd.f32 %v107_v37, %v3321_v56  ;;  %v2761_v37 = vld [vmem:[%s3829_s3 + $0x250] sm:$0xff]  }
  0x4a   :  { %2829 = vrsqrt.f32 %v362_v20 }
  0x4b   :  { %2507 = vmatpush3.bf16.msra.mxu0 %v2735_v39  ;;  %v316_v26 = vsub.f32 %v284_v23, %v300_v16  ;;  %v3293_v39 = vsub.s32 4, %v3099_v50  ;;  %v109_v16 = vrot.slane %v108_v6, 2  ;;  %v101_v23 = vrot.slane %v3342_v8, 4 }
  0x4c   :  { %2508 = vmatprep.subr.bf16.mxu0 %v2737_v53  ;;  %2529 = vmatpush3.bf16.msra.mxu1 %v2736_v47  ;;  %v3313_v53 = vsub.s32 6, %v3099_v50  ;;  %v175_v50 = vmul.f32 %v3321_v56, %v3321_v56 }
  0x4d   :  { %2530 = vmatprep.subr.bf16.mxu1 %v2738_v61  ;;  %v332_v33 = vmax.f32 %v316_v26, 0.0  ;;  %v429_v19 = vrot.slane %v3107_v57, %v3293_v39  ;;  %v3331_v61 = vld [vmem:[%s3826_s0 + $0x58] sm:$0xff]  ;;  %v529_v1 = vrot.slane %v3116_v60, %v3293_v39  ;;  %v110_v26 = vadd.f32 %v109_v16, %v108_v6  ;;  %v2758_v6 = vld [vmem:[%s3829_s3 + $0x2c8] sm:$0xff]  }
  0x4e   :  { %v236_v7 = vrot.slane %v175_v50, 4  ;;  %v437_v10 = vrot.slane %v3107_v57, %v3313_v53  ;;  %v2755_v57 = vld [vmem:[%s3829_s3 + $0x200] sm:$0xff]   ;;  %v2765_v16 = vld [vmem:[%s3829_s3 + $0x258] sm:$0xff]  }
  0x4f   :  { %2509 = vmatpush3.bf16.msra.mxu0 %v2739_v32  ;;  %v364_v29 = vadd.f32 1e-05, %v332_v33  ;;  %v119_v32 = vrot.slane %v3331_v61, 4  ;;  %v102_v33 = vadd.f32 %v101_v23, %v3342_v8 }
  0x50   :  { %2510 = vmatprep.subr.bf16.mxu0 %v2741_v3  ;;  %2531 = vmatpush3.bf16.msra.mxu1 %v2740_v9  ;;  %v2826_v14 = vpop.eup %2825  ;;  %v177_v3 = vmul.f32 %v3331_v61, %v3331_v61 }
  0x51   :  { %2532 = vmatprep.subr.bf16.mxu1 %v2742_v11  ;;  %v395_v44 = vmul.f32 %v2826_v14, %v347_v28  ;;  %2831 = vrsqrt.f32 %v364_v29  ;;  %v120_v11 = vadd.f32 %v119_v32, %v3331_v61  ;;  %v174_v28 = vmul.f32 %v3342_v8, %v3342_v8 }
  0x52   :  { %v248_v12 = vrot.slane %v177_v3, 4  ;;  %v111_v14 = vrot.slane %v110_v26, 1 }
  0x53   :  { %2511 = vmatpush3.bf16.msra.mxu0 %v2743_v13  ;;  %v2828_v41 = vpop.eup %2827  ;;  %v495_v52 = vmul.f32 %v433_v38, %v395_v44  ;;  %v121_v20 = vrot.slane %v120_v11, 2  ;;  %v103_v44 = vrot.slane %v102_v33, 2 }
  0x54   :  { %2512 = vmatprep.subr.bf16.mxu0 %v2745_v17  ;;  %2533 = vmatpush3.bf16.msra.mxu1 %v2744_v43  ;;  %v397_v47 = vmul.f32 %v2828_v41, %v349_v31  ;;  %v2830_v62 = vpop.eup %2829  ;;  %v237_v43 = vadd.f32 %v236_v7, %v175_v50  ;;  %v348_v17 = vsub.f32 %v3183_v49, %v3246_v35  ;;  %v2757_v49 = vld [vmem:[%s3829_s3 + $0x248] sm:$0xff]  }
  0x55   :  { %2534 = vmatprep.subr.bf16.mxu1 %v2746_v21  ;;  %v595_v0 = vadd.f32 %v533_v45, %v495_v52  ;;  %v394_v5 = vmul.f32 %v2830_v62, %v346_v51  ;;  %v249_v21 = vadd.f32 %v248_v12, %v177_v3  ;;  %v122_v35 = vadd.f32 %v121_v20, %v120_v11  ;;  %v2759_v51 = vld [vmem:[%s3829_s3 + $0x208] sm:$0xff]   ;;  %v2763_v12 = vld [vmem:[%s3829_s3 + $0x210] sm:$0xff]  }
  0x56   :  { %v497_v59 = vmul.f32 %v441_v18, %v397_v47  ;;  %v230_v18 = vrot.slane %v174_v28, 4  ;;  %v112_v45 = vadd.f32 %v111_v14, %v110_v26 }
  0x57   :  { %2513 = vmatpush3.bf16.msra.mxu0 %v2747_v24  ;;  %v611_v9 = vpack.c.bf16 %v595_v0, %v595_v0  ;;  %v494_v15 = vmul.f32 %v429_v19, %v394_v5  ;;  %v250_v31 = vrot.slane %v249_v21, 2  ;;  %v2756_v19 = vld [vmem:[%s3829_s3 + $0x280] sm:$0xff]  }
  0x58   :  { %2514 = vmatprep.subr.bf16.mxu0 %v2749_v27  ;;  %2535 = vmatpush3.bf16.msra.mxu1 %v2748_v30  ;;  %v597_v4 = vadd.f32 %v541_v48, %v497_v59  ;;  %v238_v27 = vrot.slane %v237_v43, 2  ;;  %v537_v30 = vrot.slane %v3116_v60, %v3313_v53  ;;  %v3364_v60 = vld [vmem:[%s3826_s0 + $0x50] sm:$0xff]  ;;  %v231_v47 = vadd.f32 %v230_v18, %v174_v28 }
  0x59   :  { %2536 = vmatprep.subr.bf16.mxu1 %v2750_v34  ;;  %1765 = vmatprep.mubr.bf16.mxu0 %v611_v9  ;;  %v594_v24 = vadd.f32 %v529_v1, %v494_v15  ;;  %v251_v41 = vadd.f32 %v250_v31, %v249_v21  ;;  %v104_v59 = vadd.f32 %v103_v44, %v102_v33  ;;  %v3375_v50 = vmul.f32 0.125, %v112_v45  ;;  %v2766_v45 = vld [vmem:[%s3829_s3 + $0x2d8] sm:$0xff]  }
  0x5a   :  { %v613_v13 = vpack.c.bf16 %v597_v4, %v597_v4  ;;  %v232_v0 = vrot.slane %v231_v47, 2  ;;  %v113_v1 = vrot.slane %v3364_v60, 4 }
  0x5b   :  { %2515 = vmatpush3.bf16.msra.mxu0 %v2751_v22  ;;  %v2832_v34 = vpop.eup %2831  ;;  %v610_v38 = vpack.c.bf16 %v594_v24, %v594_v24  ;;  %v239_v22 = vadd.f32 %v238_v27, %v237_v43  ;;  %v105_v5 = vrot.slane %v104_v59, 1  ;;  %v303_v9 = vmul.f32 %v3375_v50, %v3375_v50 }
  0x5c   :  { %2544 = vmatprep.subr.bf16.mxu0 %v2753_v40  ;;  %2537 = vmatpush3.bf16.msra.mxu1 %v2752_v46  ;;  %v396_v29 = vmul.f32 %v2832_v34, %v348_v17  ;;  %v123_v40 = vrot.slane %v122_v35, 1  ;;  %v114_v21 = vadd.f32 %v113_v1, %v3364_v60  ;;  %v176_v24 = vmul.f32 %v3364_v60, %v3364_v60  ;;  %v2764_v34 = vld [vmem:[%s3829_s3 + $0x290] sm:$0xff]  }
  0x5d   :  { %2566 = vmatprep.subr.bf16.mxu1 %v2754_v54  ;;  %1805 = vmatprep.mubr.bf16.mxu1 %v613_v13  ;;  %v240_v46 = vrot.slane %v239_v22, 1  ;;  %v252_v54 = vrot.slane %v251_v41, 1  ;;  %v106_v17 = vadd.f32 %v105_v5, %v104_v59  ;;  %v2770_v59 = vld [vmem:[%s3829_s3 + $0x2e0] sm:$0xff]  }
  0x5e   :  { %1766 = vmatmul.mubr.bf16.vlgmr.msra.gmra.mrb[4].mxu0 %v610_v38  ;;  %v496_v48 = vmul.f32 %v437_v10, %v396_v29  ;;  %v124_v52 = vadd.f32 %v123_v40, %v122_v35  ;;  %v233_v10 = vadd.f32 %v232_v0, %v231_v47  ;;  %v2767_v35 = vld [vmem:[%s3829_s3 + $0x218] sm:$0xff]   ;;  %v242_v33 = vrot.slane %v176_v24, 4  ;;  %v2769_v38 = vld [vmem:[%s3829_s3 + $0x260] sm:$0xff]   ;;  %v2777_v0 = vld [vmem:[%s3829_s3 + $0x270] sm:$0xff]  }
  0x5f   :  { %2545 = vmatpush3.bf16.msra.mxu0 %v2755_v57  ;;  %v241_v62 = vadd.f32 %v240_v46, %v239_v22  ;;  %v253_v4 = vadd.f32 %v252_v54, %v251_v41  ;;  %v2760_v57 = vld [vmem:[%s3829_s3 + $0x288] sm:$0xff]   ;;  %v3399_v27 = vmul.f32 0.125, %v106_v17  ;;  %v2771_v46 = vld [vmem:[%s3829_s3 + $0x220] sm:$0xff]  }
  0x60   :  { %2546 = vmatprep.subr.bf16.mxu0 %v2757_v49  ;;  %v596_v32 = vadd.f32 %v537_v30, %v496_v48  ;;  %v3378_v3 = vmul.f32 0.125, %v124_v52  ;;  %v234_v20 = vrot.slane %v233_v10, 1  ;;  %v115_v30 = vrot.slane %v114_v21, 2  ;;  %v2762_v49 = vld [vmem:[%s3829_s3 + $0x2d0] sm:$0xff]   ;;  %v2773_v52 = vld [vmem:[%s3829_s3 + $0x268] sm:$0xff]   ;;  %v2772_v5 = vld [vmem:[%s3829_s3 + $0x2a0] sm:$0xff]  }
  0x61   :  { %v287_v7 = vmul.f32 0.125, %v241_v62  ;;  %v289_v13 = vmul.f32 0.125, %v253_v4  ;;  %v302_v18 = vmul.f32 %v3399_v27, %v3399_v27  ;;  %v243_v41 = vadd.f32 %v242_v33, %v176_v24  ;;  %v2775_v62 = vld [vmem:[%s3829_s3 + $0x228] sm:$0xff]   ;;  %v2778_v24 = vld [vmem:[%s3829_s3 + $0x2f0] sm:$0xff]  }
  0x62   :  { %v612_v11 = vpack.c.bf16 %v596_v32, %v596_v32  ;;  %v305_v15 = vmul.f32 %v3378_v3, %v3378_v3  ;;  %v235_v28 = vadd.f32 %v234_v20, %v233_v10  ;;  %v116_v40 = vadd.f32 %v115_v30, %v114_v21  ;;  %v3494_v33 = vld [vmem:[%s3826_s0 + $0x68] sm:$0xff] }
  0x63   :  { %2547 = vmatpush3.bf16.msra.mxu0 %v2759_v51  ;;  %v319_v43 = vsub.f32 %v287_v7, %v303_v9  ;;  %v244_v48 = vrot.slane %v243_v41, 2  ;;  %v2768_v51 = vld [vmem:[%s3829_s3 + $0x298] sm:$0xff]   ;;  %v2774_v7 = vld [vmem:[%s3829_s3 + $0x2e8] sm:$0xff]   ;;  %v351_v9 = vsub.f32 %v3321_v56, %v3375_v50 }
  0x64   :  { %2548 = vmatprep.subr.bf16.mxu0 %v2761_v37  ;;  %1806 = vmatmul.mubr.bf16.vlgmr.msra.gmra.mrb[4].mxu1 %v612_v11  ;;  %v321_v23 = vsub.f32 %v289_v13, %v305_v15  ;;  %v286_v22 = vmul.f32 0.125, %v235_v28  ;;  %v117_v47 = vrot.slane %v116_v40, 1  ;;  %v353_v13 = vsub.f32 %v3331_v61, %v3378_v3  ;;  %v2779_v15 = vld [vmem:[%s3829_s3 + $0x230] sm:$0xff]   ;;  %v2776_v3 = vld [vmem:[%s3829_s3 + $0x2a8] sm:$0xff]  }
  0x65   :  { %2567 = vmatpush3.bf16.msra.mxu1 %v2756_v19  ;;  %v335_v26 = vmax.f32 %v319_v43, 0.0  ;;  %v245_v37 = vadd.f32 %v244_v48, %v243_v41  ;;  %v2781_v43 = vld [vmem:[%s3829_s3 + $0x278] sm:$0xff]  }
  0x66   :  { %2568 = vmatprep.subr.bf16.mxu1 %v2758_v6  ;;  %v337_v31 = vmax.f32 %v321_v23, 0.0  ;;  %v318_v44 = vsub.f32 %v286_v22, %v302_v18  ;;  %v118_v19 = vadd.f32 %v117_v47, %v116_v40  ;;  %v3444_v6 = vld [vmem:[%s3827_s1 + $0x8] sm:$0xff]  ;;  %v3512_v22 = vld [vmem:[%s3826_s0 + $0x60] sm:$0xff] }
  0x67   :  { %2549 = vmatpush3.bf16.msra.mxu0 %v2763_v12  ;;  %v367_v14 = vadd.f32 1e-05, %v335_v26  ;;  %v246_v4 = vrot.slane %v245_v37, 1  ;;  %v3456_v12 = vld [vmem:[%s3828_s2 + $0x8] sm:$0xff]  ;;  %v449_v56 = vrot.slane %v3444_v6, %v3102_v55  ;;  %v457_v17 = vrot.slane %v3444_v6, %v3110_v58 }
  0x68   :  { %2550 = vmatprep.subr.bf16.mxu0 %v2765_v16  ;;  %v369_v29 = vadd.f32 1e-05, %v337_v31  ;;  %v334_v54 = vmax.f32 %v318_v44, 0.0  ;;  %v3436_v32 = vmul.f32 0.125, %v118_v19  ;;  %v549_v21 = vrot.slane %v3456_v12, %v3102_v55  ;;  %v2783_v55 = vld [vmem:[%s3829_s3 + $0x238] sm:$0xff]  }
  0x69   :  { %2569 = vmatpush3.bf16.msra.mxu1 %v2760_v57  ;;  %2833 = vrsqrt.f32 %v367_v14  ;;  %v247_v10 = vadd.f32 %v246_v4, %v245_v37  ;;  %v557_v26 = vrot.slane %v3456_v12, %v3110_v58  ;;  %v445_v28 = vrot.slane %v3444_v6, %v3122_v63  ;;  %v3507_v14 = vld [vmem:[%s3826_s0 + $0x78] sm:$0xff] }
  0x6a   :  { %2570 = vmatprep.subr.bf16.mxu1 %v2762_v49  ;;  %2835 = vrsqrt.f32 %v369_v29  ;;  %v366_v1 = vadd.f32 1e-05, %v334_v54  ;;  %v304_v11 = vmul.f32 %v3436_v32, %v3436_v32  ;;  %v545_v30 = vrot.slane %v3456_v12, %v3122_v63 }
  0x6b   :  { %2551 = vmatpush3.bf16.msra.mxu0 %v2767_v35  ;;  %v288_v50 = vmul.f32 0.125, %v247_v10  ;;  %v350_v35 = vsub.f32 %v3342_v8, %v3399_v27  ;;  %v453_v58 = vrot.slane %v3444_v6, %v3127_v2  ;;  %v131_v8 = vrot.slane %v3494_v33, 4 }
  0x6c   :  { %2552 = vmatprep.subr.bf16.mxu0 %v2769_v38  ;;  %2837 = vrsqrt.f32 %v366_v1  ;;  %v2785_v38 = vld [vmem:[%s3829_s3 + $0x340] sm:$0xff]   ;;  %v179_v27 = vmul.f32 %v3494_v33, %v3494_v33  ;;  %v143_v40 = vrot.slane %v3507_v14, 4  ;;  %v181_v41 = vmul.f32 %v3507_v14, %v3507_v14 }
  0x6d   :  { %2571 = vmatpush3.bf16.msra.mxu1 %v2764_v34  ;;  %v320_v23 = vsub.f32 %v288_v50, %v304_v11  ;;  %v352_v34 = vsub.f32 %v3364_v60, %v3436_v32 }
  0x6e   :  { %2572 = vmatprep.subr.bf16.mxu1 %v2766_v45 }
  0x6f   :  { %2553 = vmatpush3.bf16.msra.mxu0 %v2771_v46  ;;  %v336_v31 = vmax.f32 %v320_v23, 0.0 }
  0x70   :  { %2554 = vmatprep.subr.bf16.mxu0 %v2773_v52 }
  0x71   :  { %2573 = vmatpush3.bf16.msra.mxu1 %v2768_v51  ;;  %v368_v29 = vadd.f32 1e-05, %v336_v31 }
  0x72   :  { %2574 = vmatprep.subr.bf16.mxu1 %v2770_v59 }
  0x73   :  { %2555 = vmatpush3.bf16.msra.mxu0 %v2775_v62  ;;  %v2834_v16 = vpop.eup %2833 }
  0x74   :  { %2556 = vmatprep.subr.bf16.mxu0 %v2777_v0  ;;  %v2836_v61 = vpop.eup %2835  ;;  %v399_v20 = vmul.f32 %v2834_v16, %v351_v9 }
  0x75   :  { %2575 = vmatpush3.bf16.msra.mxu1 %v2772_v5  ;;  %v401_v57 = vmul.f32 %v2836_v61, %v353_v13 }
  0x76   :  { %2576 = vmatprep.subr.bf16.mxu1 %v2774_v7  ;;  %v499_v49 = vmul.f32 %v449_v56, %v399_v20 }
  0x77   :  { %2557 = vmatpush3.bf16.msra.mxu0 %v2779_v15  ;;  %v501_v63 = vmul.f32 %v457_v17, %v401_v57 }
  0x78   :  { %2558 = vmatprep.subr.bf16.mxu0 %v2781_v43  ;;  %v599_v18 = vadd.f32 %v549_v21, %v499_v49 }
  0x79   :  { %15 = vsyncpa [#allocation3], 0  ;;  %v2838_v44 = vpop.eup %2837  ;;  %2577 = vmatpush3.bf16.msra.mxu1 %v2776_v3  ;;  %v2780_v45 = vld [vmem:[%s3829_s3 + $0x2b0] sm:$0xff]   ;;  %v601_v46 = vadd.f32 %v557_v26, %v501_v63  ;;  %v132_v47 = vadd.f32 %v131_v8, %v3494_v33  ;;  %v260_v48 = vrot.slane %v179_v27, 4  ;;  %v125_v51 = vrot.slane %v3512_v22, 4  ;;  %v2782_v52 = vld [vmem:[%s3829_s3 + $0x2f8] sm:$0xff]  }
  0x7a   :  { %2578 = vmatprep.subr.bf16.mxu1 %v2778_v24  ;;  %v615_v54 = vpack.c.bf16 %v599_v18, %v599_v18  ;;  %v398_v59 = vmul.f32 %v2838_v44, %v350_v35  ;;  %2839 = vrsqrt.f32 %v368_v29  ;;  %v144_v19 = vadd.f32 %v143_v40, %v3507_v14  ;;  %v3529_v37 = vld [vmem:[%s3826_s0 + $0x70] sm:$0xff]  ;;  %v2784_v11 = vld [vmem:[%s3829_s3 + $0x2b8] sm:$0xff]   ;;  %v2786_v43 = vld [vmem:[%s3829_s3 + $0x3c0] sm:$0xff]   ;;  %s2898_s11 = smov 127   ;;  %s2900_s18 = smov [#allocation2]  }
  0x7b   :  { %2559 = vmatpush3.bf16.msra.mxu0 %v2783_v55  ;;  %v617_v62 = vpack.c.bf16 %v601_v46, %v601_v46  ;;  %v133_v0 = vrot.slane %v132_v47, 2  ;;  %v261_v1 = vadd.f32 %v260_v48, %v179_v27  ;;  %v272_v4 = vrot.slane %v181_v41, 4  ;;  %v2787_v20 = vld [vmem:[%s3829_s3 + $0x300] sm:$0xff]   ;;  %v2791_v40 = vld [vmem:[%s3829_s3 + $0x308] sm:$0xff]   ;;  %v2793_v48 = vld [vmem:[%s3829_s3 + $0x350] sm:$0xff]   ;;  %s2313_s19 = sshll.u32 %s2900_s18, 4  ;;  %s2314_s19 = int_to_ptr.vmem [resolvable:$true] %s2313_s19 }
  0x7c   :  { %2588 = vmatprep.subr.bf16.mxu0 %v2785_v38  ;;  %1845 = vmatprep.mubr.bf16.mxu0 %v615_v54  ;;  %v498_v5 = vmul.f32 %v445_v28, %v398_v59  ;;  %v145_v7 = vrot.slane %v144_v19, 2  ;;  %v126_v9 = vadd.f32 %v125_v51, %v3512_v22  ;;  %v178_v10 = vmul.f32 %v3512_v22, %v3512_v22  ;;  %v2789_v28 = vld [vmem:[%s3829_s3 + $0x348] sm:$0xff]   ;;  %v2795_v60 = vld [vmem:[%s3829_s3 + $0x310] sm:$0xff]   ;;  %p2872_p1 = scmp.lt.s32.totalorder %s2314_s19, %s2314_s19 }
  0x7d   :  { %2579 = vmatpush3.bf16.msra.mxu1 %v2780_v45  ;;  %1885 = vmatprep.mubr.bf16.mxu1 %v617_v62  ;;  %v134_v13 = vadd.f32 %v133_v0, %v132_v47  ;;  %v262_v15 = vrot.slane %v261_v1, 2  ;;  %v273_v56 = vadd.f32 %v272_v4, %v181_v41  ;;  %v137_v50 = vrot.slane %v3529_v37, 4 }
  0x7e   :  { %2580 = vmatprep.subr.bf16.mxu1 %v2782_v52  ;;  %v598_v16 = vadd.f32 %v545_v30, %v498_v5  ;;  %v146_v17 = vadd.f32 %v145_v7, %v144_v19  ;;  %v127_v61 = vrot.slane %v126_v9, 2  ;;  %v254_v3 = vrot.slane %v178_v10, 4 }
  0x7f   :  { %v135_v21 = vrot.slane %v134_v13, 1  ;;  %v263_v23 = vadd.f32 %v262_v15, %v261_v1  ;;  %v274_v24 = vrot.slane %v273_v56, 2  ;;  %v138_v57 = vadd.f32 %v137_v50, %v3529_v37 }
  0x80   :  { %v614_v26 = vpack.c.bf16 %v598_v16, %v598_v16  ;;  %v147_v30 = vrot.slane %v146_v17, 1  ;;  %v128_v55 = vadd.f32 %v127_v61, %v126_v9  ;;  %v255_v49 = vadd.f32 %v254_v3, %v178_v10 }
  0x81   :  { %2581 = vmatpush3.bf16.msra.mxu1 %v2784_v11  ;;  %v136_v35 = vadd.f32 %v135_v21, %v134_v13  ;;  %v264_v31 = vrot.slane %v263_v23, 1  ;;  %v275_v63 = vadd.f32 %v274_v24, %v273_v56  ;;  %v139_v38 = vrot.slane %v138_v57, 2  ;;  %v2797_v11 = vld [vmem:[%s3829_s3 + $0x358] sm:$0xff]  }
  0x82   :  { %1846 = vmatmul.mubr.bf16.vlgmr.msra.gmra.mrb[8].mxu0 %v614_v26  ;;  %2610 = vmatprep.subr.bf16.mxu1 %v2786_v43  ;;  %v148_v8 = vadd.f32 %v147_v30, %v146_v17  ;;  %v129_v27 = vrot.slane %v128_v55, 1  ;;  %v256_v18 = vrot.slane %v255_v49, 2  ;;  %v180_v29 = vmul.f32 %v3529_v37, %v3529_v37  ;;  %v2788_v43 = vld [vmem:[%s3829_s3 + $0x380] sm:$0xff]   ;;  %v2799_v21 = vld [vmem:[%s3829_s3 + $0x318] sm:$0xff]  }
  0x83   :  { %2589 = vmatpush3.bf16.msra.mxu0 %v2787_v20  ;;  %v3553_v41 = vmul.f32 0.125, %v136_v35  ;;  %v265_v44 = vadd.f32 %v264_v31, %v263_v23  ;;  %v276_v45 = vrot.slane %v275_v63, 1  ;;  %v140_v46 = vadd.f32 %v139_v38, %v138_v57  ;;  %v2790_v20 = vld [vmem:[%s3829_s3 + $0x3c8] sm:$0xff]   ;;  %v2801_v57 = vld [vmem:[%s3829_s3 + $0x360] sm:$0xff]  }
  0x84   :  { %v2840_v47 = vpop.eup %2839  ;;  %2590 = vmatprep.subr.bf16.mxu0 %v2789_v28  ;;  %v3558_v51 = vmul.f32 0.125, %v148_v8  ;;  %v130_v52 = vadd.f32 %v129_v27, %v128_v55  ;;  %v257_v54 = vadd.f32 %v256_v18, %v255_v49  ;;  %v266_v59 = vrot.slane %v180_v29, 4  ;;  %v2792_v49 = vld [vmem:[%s3829_s3 + $0x388] sm:$0xff]   ;;  %v2803_v38 = vld [vmem:[%s3829_s3 + $0x320] sm:$0xff]  }
  0x85   :  { %v400_v19 = vmul.f32 %v2840_v47, %v352_v34  ;;  %v553_v62 = vrot.slane %v3456_v12, %v3127_v2  ;;  %v291_v0 = vmul.f32 0.125, %v265_v44  ;;  %v307_v1 = vmul.f32 %v3553_v41, %v3553_v41  ;;  %v2805_v27 = vld [vmem:[%s3829_s3 + $0x368] sm:$0xff]   ;;  %v2796_v44 = vld [vmem:[%s3829_s3 + $0x390] sm:$0xff]  }
  0x86   :  { %v277_v4 = vadd.f32 %v276_v45, %v275_v63  ;;  %v309_v5 = vmul.f32 %v3558_v51, %v3558_v51  ;;  %v3569_v7 = vmul.f32 0.125, %v130_v52  ;;  %v258_v34 = vrot.slane %v257_v54, 1  ;;  %v2794_v63 = vld [vmem:[%s3829_s3 + $0x3d0] sm:$0xff]   ;;  %v2807_v47 = vld [vmem:[%s3829_s3 + $0x328] sm:$0xff]  }
  0x87   :  { %v500_v9 = vmul.f32 %v453_v58, %v400_v19  ;;  %2591 = vmatpush3.bf16.msra.mxu0 %v2791_v40  ;;  %v323_v32 = vsub.f32 %v291_v0, %v307_v1  ;;  %v141_v10 = vrot.slane %v140_v46, 1  ;;  %v267_v56 = vadd.f32 %v266_v59, %v180_v29  ;;  %v2800_v59 = vld [vmem:[%s3829_s3 + $0x398] sm:$0xff]   ;;  %v2802_v1 = vld [vmem:[%s3829_s3 + $0x3e0] sm:$0xff]  }
  0x88   :  { %2592 = vmatprep.subr.bf16.mxu0 %v2793_v48  ;;  %v293_v13 = vmul.f32 0.125, %v277_v4  ;;  %v306_v15 = vmul.f32 %v3569_v7, %v3569_v7  ;;  %v259_v50 = vadd.f32 %v258_v34, %v257_v54  ;;  %v2809_v48 = vld [vmem:[%s3829_s3 + $0x370] sm:$0xff]   ;;  %v355_v52 = vsub.f32 %v3494_v33, %v3553_v41  ;;  %v2813_v4 = vld [vmem:[%s3829_s3 + $0x378] sm:$0xff]  }
  0x89   :  { %v600_v2 = vadd.f32 %v553_v62, %v500_v9  ;;  %v339_v58 = vmax.f32 %v323_v32, 0.0  ;;  %v142_v16 = vadd.f32 %v141_v10, %v140_v46  ;;  %v268_v61 = vrot.slane %v267_v56, 2  ;;  %v2798_v46 = vld [vmem:[%s3829_s3 + $0x3d8] sm:$0xff]   ;;  %v2811_v33 = vld [vmem:[%s3829_s3 + $0x330] sm:$0xff]   ;;  %v2804_v10 = vld [vmem:[%s3829_s3 + $0x3a0] sm:$0xff]  }
  0x8a   :  { %v325_v17 = vsub.f32 %v293_v13, %v309_v5  ;;  %v290_v24 = vmul.f32 0.125, %v259_v50  ;;  %v465_v19 = vrot.slane %v3444_v6, %v3258_v42  ;;  %v357_v41 = vsub.f32 %v3507_v14, %v3558_v51 }
  0x8b   :  { %v616_v3 = vpack.c.bf16 %v600_v2, %v600_v2  ;;  %2593 = vmatpush3.bf16.msra.mxu0 %v2795_v60  ;;  %v371_v23 = vadd.f32 1e-05, %v339_v58  ;;  %v3594_v28 = vmul.f32 0.125, %v142_v16  ;;  %v269_v30 = vadd.f32 %v268_v61, %v267_v56  ;;  %v2808_v58 = vld [vmem:[%s3829_s3 + $0x3a8] sm:$0xff]  }
  0x8c   :  { %2594 = vmatprep.subr.bf16.mxu0 %v2797_v11  ;;  %v341_v26 = vmax.f32 %v325_v17, 0.0  ;;  %v322_v55 = vsub.f32 %v290_v24, %v306_v15  ;;  %v565_v9 = vrot.slane %v3456_v12, %v3258_v42  ;;  %v473_v32 = vrot.slane %v3444_v6, %v3275_v25  ;;  %v2806_v42 = vld [vmem:[%s3829_s3 + $0x3e8] sm:$0xff]   ;;  %v2815_v11 = vld [vmem:[%s3829_s3 + $0x338] sm:$0xff]  }
  0x8d   :  { %1886 = vmatmul.mubr.bf16.vlgmr.msra.gmra.mrb[8].mxu1 %v616_v3  ;;  %2841 = vrsqrt.f32 %v371_v23  ;;  %v270_v31 = vrot.slane %v269_v30, 1  ;;  %v308_v29 = vmul.f32 %v3594_v28, %v3594_v28  ;;  %v354_v51 = vsub.f32 %v3512_v22, %v3569_v7 }
  0x8e   :  { %2611 = vmatpush3.bf16.msra.mxu1 %v2788_v43  ;;  %v373_v35 = vadd.f32 1e-05, %v341_v26  ;;  %v338_v8 = vmax.f32 %v322_v55, 0.0  ;;  %v573_v15 = vrot.slane %v3456_v12, %v3275_v25  ;;  %v461_v22 = vrot.slane %v3444_v6, %v3293_v39  ;;  %v2810_v25 = vld [vmem:[%s3829_s3 + $0x3f0] sm:$0xff]  }
  0x8f   :  { %2612 = vmatprep.subr.bf16.mxu1 %v2790_v20  ;;  %2595 = vmatpush3.bf16.msra.mxu0 %v2799_v21  ;;  %v271_v18 = vadd.f32 %v270_v31, %v269_v30  ;;  %v561_v43 = vrot.slane %v3456_v12, %v3293_v39  ;;  %v356_v20 = vsub.f32 %v3529_v37, %v3594_v28  ;;  %v2812_v21 = vld [vmem:[%s3829_s3 + $0x3b0] sm:$0xff]   ;;  %v2814_v39 = vld [vmem:[%s3829_s3 + $0x3f8] sm:$0xff]   ;;  %vm2892_vm0 = vmmov 0  }
  0x90   :  { %2596 = vmatprep.subr.bf16.mxu0 %v2801_v57  ;;  %2843 = vrsqrt.f32 %v373_v35  ;;  %v370_v40 = vadd.f32 1e-05, %v338_v8  ;;  %v469_v24 = vrot.slane %v3444_v6, %v3313_v53  ;;  %v569_v37 = vrot.slane %v3456_v12, %v3313_v53  ;;  %v2816_v28 = vld [vmem:[%s3829_s3 + $0x3b8] sm:$0xff]   ;;  %v2321_v6 = vld [vmem:[%s3830_s4] ss:$0 sm:$0xff]  ;;  %s2867_s3 = scalar_lea.vmem %s2314_s19, 128 }
  0x91   :  { %v292_v45 = vmul.f32 0.125, %v271_v18  ;;  %vm1973_vm1 = vcmask 392192   ;;  %vm2894_vm8 = vmmov 1   ;;  %vm2224_vm11 = vcmask 7168   ;;  %p2868_p0 = scmp.ne.s32.totalorder %s2314_s19, %s2867_s3  ;;  %p2873_p2 = scmp.lt.s32.totalorder %s2867_s3, %s2867_s3 }
  0x92   :  { %2613 = vmatpush3.bf16.msra.mxu1 %v2792_v49  ;;  %2845 = vrsqrt.f32 %v370_v40 }
  0x93   :  { %2614 = vmatprep.subr.bf16.mxu1 %v2794_v63  ;;  %2597 = vmatpush3.bf16.msra.mxu0 %v2803_v38  ;;  %v324_v54 = vsub.f32 %v292_v45, %v308_v29  ;;  %p2874_p3 = por %p2873_p2, %p2872_p1 }
  0x94   :  { %2598 = vmatprep.subr.bf16.mxu0 %v2805_v27 }
  0x95   :  { %v340_v62 = vmax.f32 %v324_v54, 0.0  ;;  %p2875_p4 = pnand %p2874_p3, %p2868_p0 }
  0x96   :  { %2615 = vmatpush3.bf16.msra.mxu1 %v2796_v44 }
  0x97   :  { %v2842_v0 = vpop.eup %2841  ;;  %2616 = vmatprep.subr.bf16.mxu1 %v2798_v46  ;;  %2599 = vmatpush3.bf16.msra.mxu0 %v2807_v47  ;;  %v372_v60 = vadd.f32 1e-05, %v340_v62  ;;  %v2020_v46 = vld [vmem:[%s3833_s7] sm:$0xff]  ;;  %v2021_v47 = vld [vmem:[%s3833_s7 + $0x8] sm:$0xff] }
  0x98   :  { %2600 = vmatprep.subr.bf16.mxu0 %v2809_v48  ;;  %v403_v5 = vmul.f32 %v2842_v0, %v355_v52  ;;  %v2022_v48 = vld [vmem:[%s3833_s7 + $0x10] sm:$0xff]  ;;  %v2891_v52 = vmov 0.0|0.0   ;;  %v2655_v54 = vpack.c.bf16 %v2021_v47, %v2020_v46  ;;  %v2024_v0 = vld [vmem:[%s3833_s7 + $0x20] sm:$0xff] }
  0x99   :  { %2847 = vrsqrt.f32 %v372_v60 }
  0x9a   :  { %v2844_v34 = vpop.eup %2843  ;;  %2617 = vmatpush3.bf16.msra.mxu1 %v2800_v59  ;;  %v503_v14 = vmul.f32 %v465_v19, %v403_v5  ;;  %v2023_v59 = vld [vmem:[%s3833_s7 + $0x18] sm:$0xff]  ;;  %v2893_v19 = vmov 0.0  }
  0x9b   :  { %2618 = vmatprep.subr.bf16.mxu1 %v2802_v1  ;;  %2601 = vmatpush3.bf16.msra.mxu0 %v2811_v33  ;;  %v405_v13 = vmul.f32 %v2844_v34, %v357_v41  ;;  %v2658_v62 = vpack.c.bf16 %v2023_v59, %v2022_v48  ;;  %v2025_v1 = vld [vmem:[%s3833_s7 + $0x28] sm:$0xff] }
  0x9c   :  { %2602 = vmatprep.subr.bf16.mxu0 %v2813_v4  ;;  %v603_v56 = vadd.f32 %v565_v9, %v503_v14  ;;  %v2846_v7 = vpop.eup %2845  ;;  %v2661_v4 = vpack.c.bf16 %v2025_v1, %v2024_v0  ;;  %v2450_v0 = vld [vmem:[%s3831_s5] ss:$0 sm:$0xff] }
  0x9d   :  { %v505_v2 = vmul.f32 %v473_v32, %v405_v13  ;;  %v402_v16 = vmul.f32 %v2846_v7, %v354_v51 }
  0x9e   :  { %2619 = vmatpush3.bf16.msra.mxu1 %v2804_v10  ;;  %v619_v50 = vpack.c.bf16 %v603_v56, %v603_v56 }
  0x9f   :  { %2620 = vmatprep.subr.bf16.mxu1 %v2806_v42  ;;  %2603 = vmatpush3.bf16.msra.mxu0 %v2815_v11  ;;  %v605_v17 = vadd.f32 %v573_v15, %v505_v2  ;;  %v502_v61 = vmul.f32 %v461_v22, %v402_v16 }
  0xa0   :  { %1925 = vmatprep.mubr.bf16.mxu0 %v619_v50  ;;  %2654 = vmatprep.subr.bf16.mxu0 %v2891_v52 }
  0xa1   :  { %v621_v3 = vpack.c.bf16 %v605_v17, %v605_v17  ;;  %v602_v23 = vadd.f32 %v561_v43, %v502_v61 }
  0xa2   :  { %2621 = vmatpush3.bf16.msra.mxu1 %v2808_v58 }
  0xa3   :  { %2622 = vmatprep.subr.bf16.mxu1 %v2810_v25  ;;  %1965 = vmatprep.mubr.bf16.mxu1 %v621_v3  ;;  %v2848_v57 = vpop.eup %2847  ;;  %v618_v26 = vpack.c.bf16 %v602_v23, %v602_v23 }
  0xa4   :  { %v404_v30 = vmul.f32 %v2848_v57, %v356_v20 }
  0xa5   :  { %1926 = vmatmul.mubr.bf16.vlgmr.msra.gmra.mrb[12].mxu0 %v618_v26 }
  0xa6   :  { %2623 = vmatpush3.bf16.msra.mxu1 %v2812_v21  ;;  %v504_v55 = vmul.f32 %v469_v24, %v404_v30  ;;  %2651 = vmatprep.mubr.msk.f32.mxu0 %vm2892_vm0, %v2893_v19 }
  0xa7   :  { %2624 = vmatprep.subr.bf16.mxu1 %v2814_v39  ;;  %2656 = vmatpush3.bf16.msra.mxu0 %v2655_v54 }
  0xa8   :  { %v604_v49 = vadd.f32 %v569_v37, %v504_v55  ;;  %2657 = vmatprep.subr.bf16.mxu0 %v2891_v52 }
  0xaa   :  { %2625 = vmatpush3.bf16.msra.mxu1 %v2816_v28  ;;  %v620_v35 = vpack.c.bf16 %v604_v49, %v604_v49 }
  0xab   :  { %2659 = vmatpush3.bf16.msra.mxu0 %v2658_v62 }
  0xac   :  { %2660 = vmatprep.subr.bf16.mxu0 %v2891_v52 }
  0xad   :  { %1966 = vmatmul.mubr.bf16.vlgmr.msra.gmra.mrb[12].mxu1 %v620_v35 }
  0xaf   :  { %2662 = vmatpush3.bf16.msra.mxu0 %v2661_v4 }
 0x111   :  { %v2472_v31 = vpop.f32.mrb[0].mxu0 }
 0x112   :  { %v2473_v63 = vpop.f32.mrb[1].mxu0  ;;  %v2494_v38 = vpop.f32.mrb[0].mxu1 }
 0x113   :  { %v2474_v53 = vadd.f32 %v2473_v63, %v2472_v31  ;;  %v2475_v12 = vpop.f32.mrb[2].mxu0  ;;  %v2495_v8 = vpop.f32.mrb[1].mxu1 }
 0x114   :  { %v2476_v27 = vpop.f32.mrb[3].mxu0  ;;  %v2496_v29 = vadd.f32 %v2495_v8, %v2494_v38  ;;  %v2497_v40 = vpop.f32.mrb[2].mxu1 }
 0x115   :  { %v1688_v18 = vadd.f32 %v2474_v53, %v2321_v6  ;;  %v2498_v44 = vpop.f32.mrb[3].mxu1 }
 0x117   :  { %v1728_v45 = vadd.f32 %v2496_v29, %v1688_v18 }
 0x131   :  { %v2516_v33 = vpop.f32.mrb[4].mxu0 }
 0x132   :  { %v2517_v41 = vpop.f32.mrb[5].mxu0 }
 0x133   :  { %v2518_v5 = vadd.f32 %v2517_v41, %v2516_v33  ;;  %v2519_v9 = vpop.f32.mrb[6].mxu0  ;;  %v2451_v33 = vld [vmem:[%s3832_s6] ss:$0 sm:$0xff] }
 0x134   :  { %v2520_v60 = vpop.f32.mrb[7].mxu0 }
 0x135   :  { %v1768_v32 = vadd.f32 %v2518_v5, %v1728_v45 }
 0x137   :  { %v2538_v34 = vpop.f32.mrb[4].mxu1 }
 0x138   :  { %v2539_v10 = vpop.f32.mrb[5].mxu1 }
 0x139   :  { %v2540_v14 = vadd.f32 %v2539_v10, %v2538_v34  ;;  %v2541_v51 = vpop.f32.mrb[6].mxu1  ;;  %v3714_v10 = vand.u32 127, %v410_v36 }
 0x13a   :  { %v2542_v42 = vpop.f32.mrb[7].mxu1  ;;  %v2453_v51 = vld [vmem:[%s3834_s8] ss:$0 sm:$0xff] }
 0x13b   :  { %v1808_v11 = vadd.f32 %v2540_v14, %v1768_v32  ;;  %vm2109_vm3 = vcmp.ge.s32.totalorder %v3714_v10, 4  ;;  %vm2110_vm4 = vcmp.lt.s32.totalorder %v3714_v10, 25  ;;  %vm2108_vm6 = vcmp.lt.s32.totalorder %v3714_v10, 4 }
 0x13c   :  { %vm3718_vm5 = vmand %vm2109_vm3, %vm2110_vm4 }
 0x13d   :  { %vm2124_vm7 = vmor %vm2108_vm6, %vm3718_vm5 }
 0x13e   :  { %vm3730_vm9 = vmxor %vm2124_vm7, %vm2894_vm8 }
 0x155   :  { %v2560_v13 = vpop.f32.mrb[8].mxu0 }
 0x156   :  { %v2561_v15 = vpop.f32.mrb[9].mxu0 }
 0x157   :  { %v2562_v56 = vadd.f32 %v2561_v15, %v2560_v13  ;;  %v2563_v22 = vpop.f32.mrb[10].mxu0 }
 0x158   :  { %v2564_v7 = vpop.f32.mrb[11].mxu0 }
 0x159   :  { %v1848_v2 = vadd.f32 %v2562_v56, %v1808_v11 }
 0x160   :  { %v2582_v58 = vpop.f32.mrb[8].mxu1 }
 0x161   :  { %v2583_v50 = vpop.f32.mrb[9].mxu1 }
 0x162   :  { %v2584_v16 = vadd.f32 %v2583_v50, %v2582_v58  ;;  %v2585_v43 = vpop.f32.mrb[10].mxu1 }
 0x163   :  { %v2586_v25 = vpop.f32.mrb[11].mxu1 }
 0x164   :  { %v1888_v17 = vadd.f32 %v2584_v16, %v1848_v2 }
 0x178   :  { %v2604_v61 = vpop.f32.mrb[12].mxu0 }
 0x179   :  { %v2605_v3 = vpop.f32.mrb[13].mxu0 }
 0x17a   :  { %v2606_v20 = vadd.f32 %v2605_v3, %v2604_v61  ;;  %v2607_v21 = vpop.f32.mrb[14].mxu0 }
 0x17b   :  { %v2608_v23 = vpop.f32.mrb[15].mxu0 }
 0x17c   :  { %v1928_v39 = vadd.f32 %v2606_v20, %v1888_v17 }
 0x180   :  { %v2626_v24 = vpop.f32.mrb[12].mxu1 }
 0x181   :  { %v2627_v57 = vpop.f32.mrb[13].mxu1 }
 0x182   :  { %v2628_v26 = vadd.f32 %v2627_v57, %v2626_v24  ;;  %v2629_v30 = vpop.f32.mrb[14].mxu1 }
 0x183   :  { %v2630_v37 = vpop.f32.mrb[15].mxu1 }
 0x184   :  { %v1968_v28 = vadd.f32 %v2628_v26, %v1928_v39 }
 0x186   :  { %v1974_v55 = vsel %vm1973_vm1, %v1968_v28, 0.0  ;;  %v1982_v49 = vmul.f32 %v1968_v28, %v1968_v28 }
 0x187   :  { %v1975_v35 = vrot.slane %v1974_v55, 4 }
 0x188   :  { %v1983_v31 = vsel %vm1973_vm1, %v1982_v49, 0.0 }
 0x189   :  { %v1976_v6 = vadd.f32 %v1975_v35, %v1974_v55  ;;  %v1984_v63 = vrot.slane %v1983_v31, 4 }
 0x18b   :  { %v1977_v38 = vrot.slane %v1976_v6, 2  ;;  %v1985_v53 = vadd.f32 %v1984_v63, %v1983_v31 }
 0x18d   :  { %v1978_v12 = vadd.f32 %v1977_v38, %v1976_v6  ;;  %v1986_v8 = vrot.slane %v1985_v53, 2 }
 0x18f   :  { %v1979_v27 = vrot.slane %v1978_v12, 1  ;;  %v1987_v18 = vadd.f32 %v1986_v8, %v1985_v53 }
 0x191   :  { %v1980_v29 = vadd.f32 %v1979_v27, %v1978_v12  ;;  %v1988_v40 = vrot.slane %v1987_v18, 1  ;;  %v2895_v27 = vmov 1  }
 0x192   :  { %2686 = vset.pattern.permute.xlu1 %v2895_v27 }
 0x193   :  { %v1981_v44 = vmul.f32 0.125, %v1980_v29  ;;  %v1989_v45 = vadd.f32 %v1988_v40, %v1987_v18  ;;  %v2896_v18 = vmov 0  }
 0x194   :  { %2685 = vset.pattern.permute.xlu0 %v2896_v18 }
 0x195   :  { %v1990_v46 = vmul.f32 0.125, %v1989_v45  ;;  %v1991_v47 = vmul.f32 %v1981_v44, %v1981_v44  ;;  %v1994_v59 = vsub.f32 %v1968_v28, %v1981_v44 }
 0x197   :  { %v1992_v48 = vsub.f32 %v1990_v46, %v1991_v47 }
 0x199   :  { %v1993_v52 = vmax.f32 %v1992_v48, 0.0 }
 0x19b   :  { %v1995_v54 = vadd.f32 1e-05, %v1993_v52 }
 0x19d   :  { %2849 = vrsqrt.f32 %v1995_v54 }
 0x1a7   :  { %v2850_v62 = vpop.eup %2849 }
 0x1a8   :  { %v1997_v1 = vmul.f32 %v2850_v62, %v1994_v59 }
 0x1aa   :  { %v2005_v41 = vmul.f32 %v2450_v0, %v1997_v1  ;;  %v2188_v1 = vld [vmem:[%s3835_s9] sm:$0xff]  ;;  %s2899_s9 = smov 126  }
 0x1ab   :  { %vm2189_vm10 = vcmp.ge.s32.totalorder %v2188_v1, 0 }
 0x1ac   :  { %v2013_v4 = vadd.f32 %v2451_v33, %v2005_v41  ;;  %v2191_v33 = vadd.s32 4, %v2188_v1 }
 0x1ae   :  { %v2015_v5 = vmin.f32 %v2013_v4, 0.0  ;;  %vm2014_vm2 = vcmp.gt.f32.partialorder %v2013_v4, 0.0  ;;  %v2192_v41 = vsel %vm2189_vm10, %v2191_v33, 4294967295 }
 0x1b0   :  { %v2016_v9 = vmul.f32 1.442695, %v2015_v5  ;;  %v2190_v5 = vsel %vm2189_vm10, %v2188_v1, 4294967295 }
 0x1b2   :  { %2851 = vpow2.f32 %v2016_v9 }
 0x1bc   :  { %v2852_v60 = vpop.eup %2851 }
 0x1bd   :  { %v2452_v32 = vadd.f32 -1.0, %v2852_v60  ;;  %v2897_v60 = vmov 2  }
 0x1bf   :  { %v2019_v34 = vsel %vm2014_vm2, %v2013_v4, %v2452_v32  ;;  %v2193_v4 = vadd.s32 25, %v2188_v1  ;;  %v2455_v32 = vsel %vm2189_vm10, 1.0, %v2893_v19  ;;  %vm2304_vm2 = vcmask 400384  }
 0x1c0   :  { %2652 = vmatmul.mubr.msk.f32.vlgmr.msra.gmra.mrb[16].mxu0 %vm1973_vm1, %v2019_v34 }
 0x1c1   :  { %v2194_v9 = vsel %vm2189_vm10, %v2193_v4, 4294967295 }
 0x293   :  { %v2102_v36 = vpop.f32.mrb[16].mxu0 }
 0x294   :  { %v2103_v42 = vadd.f32 %v2453_v51, %v2102_v36  ;;  %v2653_v11 = vpop.f32.mrb[17].mxu0  ;;  %v2225_v36 = vsel %vm2224_vm11, %v2455_v32, 0.0 }
 0x296   :  { %v2120_v15 = vsel %vm3718_vm5, %v2103_v42, -inf  ;;  %v2114_v56 = vsel %vm2108_vm6, %v2103_v42, -inf  ;;  %v2128_v2 = vsel %vm3730_vm9, %v2103_v42, -inf }
 0x297   :  { %v2121_v22 = vsel %vm1973_vm1, %v2120_v15, -inf  ;;  %v2115_v7 = vsel %vm1973_vm1, %v2114_v56, -inf  ;;  %v2129_v58 = vsel %vm1973_vm1, %v2128_v2, -inf }
 0x298   :  { %2122 = vmax.xlane.f32.xlu0 %v2121_v22  ;;  %2116 = vmax.xlane.f32.xlu1 %v2115_v7 }
 0x29c   :  { %2130 = vmax.xlane.f32.xlu0 %v2129_v58 }
 0x325   :  { %v2123_v50 = vpop.xlane.xlu0 %2122  ;;  %v2117_v43 = vpop.xlane.xlu1 %2116 }
 0x329   :  { %v2131_v16 = vpop.xlane.xlu0 %2130 }
 0x32a   :  { %v2132_v25 = vsel %vm3718_vm5, %v2123_v50, %v2131_v16 }
 0x32b   :  { %v2133_v17 = vsel %vm2108_vm6, %v2117_v43, %v2132_v25 }
 0x32c   :  { %v2134_v61 = vsub.f32 %v2103_v42, %v2133_v17 }
 0x32e   :  { %v2135_v3 = vmul.f32 1.442695, %v2134_v61 }
 0x330   :  { %2853 = vpow2.f32 %v2135_v3 }
 0x33a   :  { %v2854_v20 = vpop.eup %2853 }
 0x33b   :  { %v2145_v21 = vsel %vm3730_vm9, %v2854_v20, 0.0  ;;  %v2141_v23 = vsel %vm3718_vm5, %v2854_v20, 0.0  ;;  %v2137_v57 = vsel %vm2108_vm6, %v2854_v20, 0.0 }
 0x33c   :  { %v2146_v39 = vsel %vm1973_vm1, %v2145_v21, 0.0  ;;  %v2142_v24 = vsel %vm1973_vm1, %v2141_v23, 0.0  ;;  %v2138_v26 = vsel %vm1973_vm1, %v2137_v57, 0.0 }
 0x33d   :  { %2147 = vadd.xlane.f32.xlu0 %v2146_v39  ;;  %2143 = vadd.xlane.f32.xlu1 %v2142_v24 }
 0x341   :  { %2139 = vadd.xlane.f32.xlu1 %v2138_v26 }
 0x3ca   :  { %v2144_v30 = vpop.xlane.xlu1 %2143  ;;  %v2148_v37 = vpop.xlane.xlu0 %2147 }
 0x3cb   :  { %v2149_v28 = vsel %vm3718_vm5, %v2144_v30, %v2148_v37 }
 0x3ce   :  { %v2140_v55 = vpop.xlane.xlu1 %2139 }
 0x3cf   :  { %v2150_v49 = vsel %vm2108_vm6, %v2140_v55, %v2149_v28 }
 0x3d0   :  { %2855 = vrcp.f32 %v2150_v49 }
 0x3da   :  { %v2856_v35 = vpop.eup %2855 }
 0x3db   :  { %v3760_v31 = vmul.f32 %v2856_v35, %v2854_v20 }
 0x3dd   :  { %v2161_v6 = vsel %vm3730_vm9, %v3760_v31, -inf  ;;  %v2157_v63 = vsel %vm3718_vm5, %v3760_v31, -inf  ;;  %v2153_v12 = vsel %vm2108_vm6, %v3760_v31, -inf }
 0x3de   :  { %v2162_v38 = vsel %vm1973_vm1, %v2161_v6, -inf  ;;  %v2158_v53 = vsel %vm1973_vm1, %v2157_v63, -inf  ;;  %v2154_v8 = vsel %vm1973_vm1, %v2153_v12, -inf }
 0x3df   :  { %2163 = vmax.xlane.f32.xlu1 %v2162_v38  ;;  %2159 = vmax.xlane.f32.xlu0 %v2158_v53 }
 0x3e3   :  { %2155 = vmax.xlane.f32.xlu0 %v2154_v8 }
 0x46c   :  { %v2160_v29 = vpop.xlane.xlu0 %2159  ;;  %v2164_v40 = vpop.xlane.xlu1 %2163 }
 0x46d   :  { %v2165_v44 = vsel %vm3718_vm5, %v2160_v29, %v2164_v40 }
 0x470   :  { %v2156_v45 = vpop.xlane.xlu0 %2155 }
 0x471   :  { %v2166_v46 = vsel %vm2108_vm6, %v2156_v45, %v2165_v44 }
 0x472   :  { %v2167_v47 = vsub.f32 %v3760_v31, %v2166_v46 }
 0x474   :  { %v2168_v48 = vmul.f32 1.442695, %v2167_v47 }
 0x476   :  { %2857 = vpow2.f32 %v2168_v48 }
 0x480   :  { %v2858_v52 = vpop.eup %2857 }
 0x481   :  { %v2178_v54 = vsel %vm3730_vm9, %v2858_v52, 0.0  ;;  %v2174_v59 = vsel %vm3718_vm5, %v2858_v52, 0.0  ;;  %v2170_v34 = vsel %vm2108_vm6, %v2858_v52, 0.0 }
 0x482   :  { %v2179_v62 = vsel %vm1973_vm1, %v2178_v54, 0.0  ;;  %v2175_v0 = vsel %vm1973_vm1, %v2174_v59, 0.0  ;;  %v2171_v51 = vsel %vm1973_vm1, %v2170_v34, 0.0 }
 0x483   :  { %2180 = vadd.xlane.f32.xlu0 %v2179_v62  ;;  %2176 = vadd.xlane.f32.xlu1 %v2175_v0 }
 0x494   :  { %2200 = vperm.xlu1 %2686, %v2192_v41  }
 0x498   :  { %2687 = vset.pattern.permute.xlu1 %v2897_v60 }
 0x499   :  { %2196 = vperm.xlu0 %2685, %v2190_v5   ;;  %2205 = vperm.xlu1 %2687, %v2194_v9  }
 0x49d   :  { %2253 = vrot.lane.b32.xlu1 %v2455_v32, %s2898_s11  ;;  %2688 = vset.pattern.permute.xlu0 %v2897_v60 }
 0x4b8   :  { %2226 = vadd.xlane.f32.xlu0 %v2225_v36 }
 0x4c1   :  { %2172 = vadd.xlane.f32.xlu1 %v2171_v51 }
 0x4d2   :  { %2284 = vrot.lane.b32.xlu1 %v2455_v32, %s2899_s9 }
 0x510   :  { %v2177_v42 = vpop.xlane.xlu1 %2176  ;;  %v2181_v11 = vpop.xlane.xlu0 %2180 }
 0x511   :  { %v2182_v2 = vsel %vm3718_vm5, %v2177_v42, %v2181_v11 }
 0x514   :  { %v2201_v15 = vpop.permute.xlu1 %2200 }
 0x515   :  { %vm2202_vm12 = vcmp.eq.s32.totalorder %v3714_v10, %v2201_v15 }
 0x518   :  { %v2197_v56 = vpop.permute.xlu0 %2196  ;;  %v2206_v19 = vpop.permute.xlu1 %2205 }
 0x519   :  { %vm2198_vm13 = vcmp.eq.s32.totalorder %v3714_v10, %v2197_v56  ;;  %vm2207_vm14 = vcmp.eq.s32.totalorder %v3714_v10, %v2206_v19 }
 0x51a   :  { %vm2203_vm15 = vmor %vm2198_vm13, %vm2202_vm12 }
 0x51b   :  { %vm2208_vm0 = vmor %vm2203_vm15, %vm2207_vm14 }
 0x51c   :  { %v2254_v22 = vpop.permute.xlu1 %2253 }
 0x51d   :  { %v2256_v7 = vsel %vm2224_vm11, %v2254_v22, 0.0 }
 0x51e   :  { %2257 = vadd.xlane.f32.xlu1 %v2256_v7 }
 0x545   :  { %v2227_v30 = vpop.xlane.xlu0 %2226 }
 0x546   :  { %v2228_v37 = vrot.slane %v2227_v30, 4 }
 0x548   :  { %v2229_v55 = vadd.f32 %v2228_v37, %v2227_v30 }
 0x54a   :  { %v2230_v6 = vrot.slane %v2229_v55, 2 }
 0x54c   :  { %v2231_v13 = vadd.f32 %v2230_v6, %v2229_v55 }
 0x54e   :  { %v2173_v58 = vpop.xlane.xlu1 %2172  ;;  %v2232_v47 = vrot.slane %v2231_v13, 1 }
 0x54f   :  { %v2183_v50 = vsel %vm2108_vm6, %v2173_v58, %v2182_v2 }
 0x550   :  { %2859 = vlog2.f32 %v2183_v50  ;;  %v2233_v41 = vadd.f32 %v2232_v47, %v2231_v13 }
 0x552   :  { %v2285_v16 = vpop.permute.xlu1 %2284 }
 0x553   :  { %v2287_v43 = vsel %vm2224_vm11, %v2285_v16, 0.0 }
 0x554   :  { %2288 = vadd.xlane.f32.xlu0 %v2287_v43 }
 0x55a   :  { %v2860_v25 = vpop.eup %2859 }
 0x55b   :  { %v2185_v17 = vmul.f32 0.6931472, %v2860_v25 }
 0x55d   :  { %v2186_v61 = vadd.f32 %v2185_v17, %v2166_v46 }
 0x55f   :  { %v2187_v3 = vsub.f32 %v3760_v31, %v2186_v61 }
 0x561   :  { %v2209_v20 = vsel %vm2208_vm0, %v2187_v3, 0.0 }
 0x562   :  { %v2210_v21 = vsel %vm2108_vm6, %v2209_v20, 0.0  ;;  %v2240_v39 = vsel %vm3718_vm5, %v2209_v20, 0.0  ;;  %v2272_v57 = vsel %vm3730_vm9, %v2209_v20, 0.0 }
 0x563   :  { %v2211_v23 = vsel %vm1973_vm1, %v2210_v21, 0.0  ;;  %v2241_v24 = vsel %vm1973_vm1, %v2240_v39, 0.0  ;;  %v2273_v26 = vsel %vm1973_vm1, %v2272_v57, 0.0 }
 0x564   :  { %2212 = vadd.xlane.f32.xlu1 %v2211_v23 }
 0x568   :  { %2242 = vadd.xlane.f32.xlu1 %v2241_v24 }
 0x56c   :  { %2274 = vadd.xlane.f32.xlu1 %v2273_v26 }
 0x5ab   :  { %v2258_v28 = vpop.xlane.xlu1 %2257 }
 0x5ac   :  { %v2259_v10 = vrot.slane %v2258_v28, 4 }
 0x5ae   :  { %v2260_v35 = vadd.f32 %v2259_v10, %v2258_v28 }
 0x5b0   :  { %v2261_v12 = vrot.slane %v2260_v35, 2 }
 0x5b2   :  { %v2262_v48 = vadd.f32 %v2261_v12, %v2260_v35 }
 0x5b4   :  { %v2263_v4 = vrot.slane %v2262_v48, 1 }
 0x5b6   :  { %v2264_v34 = vadd.f32 %v2263_v4, %v2262_v48 }
 0x5e1   :  { %v2289_v49 = vpop.xlane.xlu0 %2288 }
 0x5e2   :  { %v2290_v14 = vrot.slane %v2289_v49, 4 }
 0x5e4   :  { %v2291_v8 = vadd.f32 %v2290_v14, %v2289_v49 }
 0x5e6   :  { %v2292_v45 = vrot.slane %v2291_v8, 2 }
 0x5e8   :  { %v2293_v33 = vadd.f32 %v2292_v45, %v2291_v8 }
 0x5ea   :  { %v2294_v51 = vrot.slane %v2293_v33, 1 }
 0x5ec   :  { %v2295_v11 = vadd.f32 %v2294_v51, %v2293_v33 }
 0x5f1   :  { %v2213_v63 = vpop.xlane.xlu1 %2212 }
 0x5f2   :  { %v2214_v38 = vrot.slane %v2213_v63, 4 }
 0x5f4   :  { %v2215_v53 = vadd.f32 %v2214_v38, %v2213_v63 }
 0x5f5   :  { %v2243_v27 = vpop.xlane.xlu1 %2242 }
 0x5f6   :  { %v2216_v18 = vrot.slane %v2215_v53, 2  ;;  %v2244_v29 = vrot.slane %v2243_v27, 4 }
 0x5f8   :  { %v2245_v40 = vadd.f32 %v2244_v29, %v2243_v27  ;;  %v2217_v44 = vadd.f32 %v2216_v18, %v2215_v53 }
 0x5f9   :  { %v2275_v46 = vpop.xlane.xlu1 %2274 }
 0x5fa   :  { %v2246_v52 = vrot.slane %v2245_v40, 2  ;;  %v2276_v54 = vrot.slane %v2275_v46, 4  ;;  %v2218_v59 = vrot.slane %v2217_v44, 1 }
 0x5fc   :  { %v2277_v62 = vadd.f32 %v2276_v54, %v2275_v46  ;;  %v2219_v0 = vadd.f32 %v2218_v59, %v2217_v44  ;;  %v2247_v1 = vadd.f32 %v2246_v52, %v2245_v40 }
 0x5fe   :  { %v2278_v5 = vrot.slane %v2277_v62, 2  ;;  %2663 = vpush %v2219_v0  ;;  %v2248_v9 = vrot.slane %v2247_v1, 1 }
 0x5ff   :  { %2665 = vpush %v2233_v41 }
 0x600   :  { %v2279_v60 = vadd.f32 %v2278_v5, %v2277_v62  ;;  %v2249_v32 = vadd.f32 %v2248_v9, %v2247_v1 }
 0x602   :  { %2667 = vpush %v2249_v32  ;;  %v2280_v36 = vrot.slane %v2279_v60, 1 }
 0x603   :  { %2669 = vpush %v2264_v34 }
 0x604   :  { %v2281_v42 = vadd.f32 %v2280_v36, %v2279_v60 }
 0x606   :  { %2671 = vpush %v2281_v42 }
 0x607   :  { %2673 = vpush %v2295_v11 }
 0x62f   :  { %s2664_s12 = spop %2663 }
 0x630   :  { %s2666_s13 = spop %2665  ;;  %v2221_v50 = vstv %s2664_s12 }
 0x631   :  { %v2235_v15 = vstv %s2666_s13  ;;  %v2236_v61 = vsub.f32 0.0, %v2221_v50 }
 0x632   :  { %v2237_v56 = vmax.f32 %v2235_v15, 1.0 }
 0x633   :  { %s2668_s14 = spop %2667 }
 0x634   :  { %s2670_s15 = spop %2669  ;;  %2861 = vrcp.f32 %v2237_v56  ;;  %v2251_v58 = vstv %s2668_s14 }
 0x635   :  { %v2266_v19 = vstv %s2670_s15  ;;  %v2267_v43 = vsub.f32 0.0, %v2251_v58 }
 0x636   :  { %v2268_v22 = vmax.f32 %v2266_v19, 1.0 }
 0x637   :  { %s2672_s16 = spop %2671 }
 0x638   :  { %2863 = vrcp.f32 %v2268_v22  ;;  %s2674_s17 = spop %2673  ;;  %v2283_v17 = vstv %s2672_s16 }
 0x639   :  { %v2297_v7 = vstv %s2674_s17  ;;  %v2298_v20 = vsub.f32 0.0, %v2283_v17 }
 0x63a   :  { %v2299_v2 = vmax.f32 %v2297_v7, 1.0 }
 0x63c   :  { %2865 = vrcp.f32 %v2299_v2 }
 0x63e   :  { %v2862_v16 = vpop.eup %2861 }
 0x63f   :  { %v2239_v21 = vmul.f32 %v2862_v16, %v2236_v61 }
 0x642   :  { %v2864_v25 = vpop.eup %2863 }
 0x643   :  { %v2270_v3 = vmul.f32 %v2864_v25, %v2267_v43 }
 0x645   :  { %v2271_v39 = vadd.f32 %v2270_v3, %v2239_v21 }
 0x646   :  { %v2866_v23 = vpop.eup %2865 }
 0x647   :  { %v2301_v24 = vmul.f32 %v2866_v23, %v2298_v20 }
 0x649   :  { %v2302_v57 = vadd.f32 %v2301_v24, %v2271_v39 }
 0x64b   :  { %v2303_v26 = vsel %vm1973_vm1, %v3760_v31, %v2302_v57 }
 0x64c   :  { %v2305_v30 = vsel %vm2304_vm2, %v2303_v26, 0.0 }
 0x64d   :  { %2306 = vst [vmem:[#allocation2] sm:$0xff] %v2305_v30 }
 0x64e   :  { %2878 = shalt.err (!%p2875_p4)
}
 0x64f   :  { %s2879_s21 = scalar_lea.hbm %s3836_s10, 128 }
 0x650   :  { %p2880_p5 = scmp.ne.s32.totalorder %s3836_s10, %s2879_s21  ;;  %p2883_p6 = scmp.lt.u32.totalorder %s2879_s21, %s3836_s10 }
 0x652   :  { %p2885_p7 = pnand %p2883_p6, %p2880_p5 }
 0x654   :  { %2888 = shalt.err (!%p2885_p7)
}
 0x655   :  { %2316 = dma.vmem_to_hbm [thread:$0]  %s2314_s19, 128, %s3836_s10, [#allocation3]  }
 0x656   :  { %2889 = dma.done.wait [#allocation3], 128  }
 0x657   :  { %2890 = vsyncadd [#allocation3], 4294967168 }
 0x658   :  { %2320 = vsyncpa [#allocation3], 1 }

</bundles_post_ra>
